<compile_context>
chip_gen: v5e
topology: v5e:2x2
jax: 0.10.0
libtpu: 0.0.40
codegen_flags: <defaults>
</compile_context>

<pallas_src>
import jax
import jax.numpy as jnp
from jax.experimental import pallas as pl
from jax.experimental.pallas import tpu as pltpu

# ----------------------- problem sizes (small, synthetic) -----------------------
B = 2          # batch
D = 128        # channels ("d") -- 128 so channels exactly fill the sublane tiles
G = 128        # grouped points ("g") -- lane-dense point axis
NBLOCKS = 2    # PosExtraction(blocks=2)
BN_EPS = 1e-5
NCOLS = B * G  # batch packed into the lane/N dimension -> 256 matmul columns


# ----------------------------- Pallas kernel ------------------------------------
def pos_extraction_kernel(x_ref, w1_ref, b1_ref, w2_ref, b2_ref, o_ref):
    # x_ref:  (B, D, G)          PyTorch NCW layout, whole array resident in VMEM
    # w1_ref: (NBLOCKS, D, D)    BN-folded net1 weights, stored as (out, in)
    # b1_ref: (NBLOCKS, D, NCOLS) BN-folded net1 bias, pre-broadcast along lanes
    # w2_ref: (NBLOCKS, D, D)    BN-folded net2 weights, stored as (out, in)
    # b2_ref: (NBLOCKS, D, NCOLS) BN-folded net2 bias, pre-broadcast along lanes
    # o_ref:  (B, D, G)
    #
    # Pack the batch into the lane/N dimension: (D, B*G).  Column offsets are
    # multiples of 128, so this is vreg placement only -- no XLU transpose, no
    # cross-lane shuffle.  Native [d, g] layout is kept end to end.
    h = jnp.concatenate([x_ref[b] for b in range(B)], axis=1)   # (D, NCOLS) f32

    for blk in range(NBLOCKS):                       # static unroll over residual blocks
        w1 = w1_ref[blk]                             # (D_out, D_in)
        b1 = b1_ref[blk]                             # (D, NCOLS)  plain VPU add
        w2 = w2_ref[blk]                             # (D_out, D_in)
        b2 = b2_ref[blk]                             # (D, NCOLS)
        # net1: Conv1d(k=1) + BN + ReLU  ->  relu(W1 @ h + b1)   (128,128)@(128,256)
        t = jnp.dot(w1, h, preferred_element_type=jnp.float32) + b1
        t = jnp.maximum(t, 0.0)
        # net2: Conv1d(k=1) + BN         ->  W2 @ t + b2
        t = jnp.dot(w2, t, preferred_element_type=jnp.float32) + b2
        # residual + outer ReLU
        h = jnp.maximum(t + h, 0.0)

    # Unpack the lane-packed batches straight into the [B, D, G] output (lane-aligned
    # slices -> unmasked, lane-dense stores; no exit transpose).
    for b in range(B):
        o_ref[b] = h[:, b * G:(b + 1) * G]


def pos_extraction_pallas(x_bdg, w1, b1, w2, b2):
    """x_bdg: [B, D, G] (PyTorch layout). Returns [B, D, G]."""
    vmem = lambda: pl.BlockSpec(memory_space=pltpu.MemorySpace.VMEM)
    itemsize = 4
    bytes_accessed = (
        B * D * G * itemsize                      # x
        + 2 * NBLOCKS * D * D * itemsize          # w1, w2
        + 2 * NBLOCKS * D * NCOLS * itemsize      # b1, b2 (pre-broadcast)
        + B * D * G * itemsize                    # out
    )
    flops = NBLOCKS * 2 * (2 * D * D * NCOLS)     # 2 matmuls per block
    return pl.pallas_call(
        pos_extraction_kernel,
        out_shape=jax.ShapeDtypeStruct((B, D, G), jnp.float32),
        # No grid: single invocation, every operand is a whole-array VMEM block
        # (no pipelining, no double-buffered weight copies; total < 1.5 MiB VMEM).
        in_specs=[vmem(), vmem(), vmem(), vmem(), vmem()],
        out_specs=vmem(),
        cost_estimate=pl.CostEstimate(
            flops=flops, transcendentals=0, bytes_accessed=bytes_accessed),
    )(x_bdg, w1, b1, w2, b2)


# ------------------------- parameter construction (glue) ------------------------
def fold_conv_bn(w_oi, b_o, gamma, beta, mean, var):
    """Fold eval-mode BatchNorm1d into a k=1 Conv1d.

    w_oi: (out, in) conv weight, b_o: (out,) conv bias.
    Returns (W_eff (out, in), b_eff (out,)) such that
      W_eff @ x_dg + b_eff[:, None] == BN(Conv1d(x)) in the native [d, g] layout.
    """
    scale = gamma / jnp.sqrt(var + BN_EPS)          # (out,)
    w_eff = w_oi * scale[:, None]                   # (out, in)  -- NO transpose
    b_eff = scale * (b_o - mean) + beta             # (out,)
    return w_eff, b_eff


def make_params(key):
    """Deterministic synthetic parameters for NBLOCKS ConvBNReLURes1D blocks."""
    w1s, b1s, w2s, b2s = [], [], [], []
    for blk in range(NBLOCKS):
        keys = jax.random.split(jax.random.fold_in(key, blk), 12)
        # net1 conv + BN
        w1 = jax.random.normal(keys[0], (D, D), jnp.float32) * 0.05
        c1 = jax.random.normal(keys[1], (D,), jnp.float32) * 0.05
        g1 = 1.0 + 0.1 * jax.random.normal(keys[2], (D,), jnp.float32)
        be1 = 0.1 * jax.random.normal(keys[3], (D,), jnp.float32)
        m1 = 0.1 * jax.random.normal(keys[4], (D,), jnp.float32)
        v1 = jnp.abs(jax.random.normal(keys[5], (D,), jnp.float32)) + 0.5
        # net2 conv + BN
        w2 = jax.random.normal(keys[6], (D, D), jnp.float32) * 0.05
        c2 = jax.random.normal(keys[7], (D,), jnp.float32) * 0.05
        g2 = 1.0 + 0.1 * jax.random.normal(keys[8], (D,), jnp.float32)
        be2 = 0.1 * jax.random.normal(keys[9], (D,), jnp.float32)
        m2 = 0.1 * jax.random.normal(keys[10], (D,), jnp.float32)
        v2 = jnp.abs(jax.random.normal(keys[11], (D,), jnp.float32)) + 0.5

        we1, beff1 = fold_conv_bn(w1, c1, g1, be1, m1, v1)
        we2, beff2 = fold_conv_bn(w2, c2, g2, be2, m2, v2)
        w1s.append(we1)
        w2s.append(we2)
        # Pre-broadcast biases along the packed lane dimension -> plain VPU adds
        # in the kernel (no in-kernel lane broadcast through the XLU).
        b1s.append(jnp.broadcast_to(beff1[:, None], (D, NCOLS)))
        b2s.append(jnp.broadcast_to(beff2[:, None], (D, NCOLS)))
    return (jnp.stack(w1s), jnp.stack(b1s), jnp.stack(w2s), jnp.stack(b2s))


# ------------------------------- pure-JAX reference ------------------------------
def pos_extraction_ref(x_bdg, w1, b1, w2, b2):
    h = x_bdg  # [B, D, G], native layout throughout
    for blk in range(NBLOCKS):
        bias1 = b1[blk][None, :, :1]   # (1, D, 1) -- all pre-broadcast columns equal
        bias2 = b2[blk][None, :, :1]
        t = jnp.maximum(jnp.einsum("oi,big->bog", w1[blk], h) + bias1, 0.0)
        t = jnp.einsum("oi,big->bog", w2[blk], t) + bias2
        h = jnp.maximum(t + h, 0.0)
    return h


# -------------------------------------- main -------------------------------------
if __name__ == "__main__":
    key = jax.random.PRNGKey(0)
    k_x, k_p = jax.random.split(key)
    x = jax.random.normal(k_x, (B, D, G), jnp.float32)   # PyTorch layout [b, d, g]
    w1, b1, w2, b2 = make_params(k_p)

    out = pos_extraction_pallas(x, w1, b1, w2, b2)
    out = jax.block_until_ready(out)

    ref = pos_extraction_ref(x, w1, b1, w2, b2)
    assert out.shape == (B, D, G)
    max_err = float(jnp.max(jnp.abs(out - ref)))
    assert max_err < 1e-3, f"mismatch vs reference: max abs err = {max_err}"

    print("KERNEL_OK")
</pallas_src>

<mosaic_0001>
module attributes {stable_mosaic.version = 11 : i64} {
  func.func @pos_extraction_kernel(%arg0: memref<2x128x128xf32, #tpu.memory_space<vmem>>, %arg1: memref<2x128x128xf32, #tpu.memory_space<vmem>>, %arg2: memref<2x128x256xf32, #tpu.memory_space<vmem>>, %arg3: memref<2x128x128xf32, #tpu.memory_space<vmem>>, %arg4: memref<2x128x256xf32, #tpu.memory_space<vmem>>, %arg5: memref<2x128x128xf32, #tpu.memory_space<vmem>>) attributes {dimension_semantics = [], scalar_prefetch = 0 : i64, scratch_operands = 0 : i64, tpu.core_type = #tpu.core_type<tc>} {
    %c0 = arith.constant 0 : index
    %c0_0 = arith.constant 0 : index
    %c0_1 = arith.constant 0 : index
    %0 = vector.load %arg0[%c0, %c0_0, %c0_1] : memref<2x128x128xf32, #tpu.memory_space<vmem>>, vector<1x128x128xf32>
    %1 = vector.shape_cast %0 : vector<1x128x128xf32> to vector<128x128xf32>
    %c1 = arith.constant 1 : index
    %c0_2 = arith.constant 0 : index
    %c0_3 = arith.constant 0 : index
    %2 = vector.load %arg0[%c1, %c0_2, %c0_3] : memref<2x128x128xf32, #tpu.memory_space<vmem>>, vector<1x128x128xf32>
    %3 = vector.shape_cast %2 : vector<1x128x128xf32> to vector<128x128xf32>
    %4 = tpu.concatenate %1, %3 in 1 : vector<128x128xf32>, vector<128x128xf32> -> vector<128x256xf32>
    %c0_4 = arith.constant 0 : index
    %c0_5 = arith.constant 0 : index
    %c0_6 = arith.constant 0 : index
    %5 = vector.load %arg1[%c0_4, %c0_5, %c0_6] : memref<2x128x128xf32, #tpu.memory_space<vmem>>, vector<1x128x128xf32>
    %6 = vector.shape_cast %5 : vector<1x128x128xf32> to vector<128x128xf32>
    %c0_7 = arith.constant 0 : index
    %c0_8 = arith.constant 0 : index
    %c0_9 = arith.constant 0 : index
    %7 = vector.load %arg2[%c0_7, %c0_8, %c0_9] : memref<2x128x256xf32, #tpu.memory_space<vmem>>, vector<1x128x256xf32>
    %8 = vector.shape_cast %7 : vector<1x128x256xf32> to vector<128x256xf32>
    %c0_10 = arith.constant 0 : index
    %c0_11 = arith.constant 0 : index
    %c0_12 = arith.constant 0 : index
    %9 = vector.load %arg3[%c0_10, %c0_11, %c0_12] : memref<2x128x128xf32, #tpu.memory_space<vmem>>, vector<1x128x128xf32>
    %10 = vector.shape_cast %9 : vector<1x128x128xf32> to vector<128x128xf32>
    %c0_13 = arith.constant 0 : index
    %c0_14 = arith.constant 0 : index
    %c0_15 = arith.constant 0 : index
    %11 = vector.load %arg4[%c0_13, %c0_14, %c0_15] : memref<2x128x256xf32, #tpu.memory_space<vmem>>, vector<1x128x256xf32>
    %12 = vector.shape_cast %11 : vector<1x128x256xf32> to vector<128x256xf32>
    %cst = arith.constant dense<0.000000e+00> : vector<128x256xf32>
    %13 = tpu.matmul %6, %4, %cst {dimension_numbers = #tpu.dot_dimension_numbers<[1], [0], [0], [1], [0, 0, 1, 1], [], []>} : vector<128x128xf32>, vector<128x256xf32>, vector<128x256xf32> -> vector<128x256xf32>
    %14 = arith.addf %13, %8 : vector<128x256xf32>
    %cst_16 = arith.constant 0.000000e+00 : f32
    %15 = vector.broadcast %cst_16 : f32 to vector<128x256xf32>
    %16 = arith.maximumf %14, %15 : vector<128x256xf32>
    %cst_17 = arith.constant dense<0.000000e+00> : vector<128x256xf32>
    %17 = tpu.matmul %10, %16, %cst_17 {dimension_numbers = #tpu.dot_dimension_numbers<[1], [0], [0], [1], [0, 0, 1, 1], [], []>} : vector<128x128xf32>, vector<128x256xf32>, vector<128x256xf32> -> vector<128x256xf32>
    %18 = arith.addf %17, %12 : vector<128x256xf32>
    %19 = arith.addf %18, %4 : vector<128x256xf32>
    %cst_18 = arith.constant 0.000000e+00 : f32
    %20 = vector.broadcast %cst_18 : f32 to vector<128x256xf32>
    %21 = arith.maximumf %19, %20 : vector<128x256xf32>
    %c1_19 = arith.constant 1 : index
    %c0_20 = arith.constant 0 : index
    %c0_21 = arith.constant 0 : index
    %22 = vector.load %arg1[%c1_19, %c0_20, %c0_21] : memref<2x128x128xf32, #tpu.memory_space<vmem>>, vector<1x128x128xf32>
    %23 = vector.shape_cast %22 : vector<1x128x128xf32> to vector<128x128xf32>
    %c1_22 = arith.constant 1 : index
    %c0_23 = arith.constant 0 : index
    %c0_24 = arith.constant 0 : index
    %24 = vector.load %arg2[%c1_22, %c0_23, %c0_24] : memref<2x128x256xf32, #tpu.memory_space<vmem>>, vector<1x128x256xf32>
    %25 = vector.shape_cast %24 : vector<1x128x256xf32> to vector<128x256xf32>
    %c1_25 = arith.constant 1 : index
    %c0_26 = arith.constant 0 : index
    %c0_27 = arith.constant 0 : index
    %26 = vector.load %arg3[%c1_25, %c0_26, %c0_27] : memref<2x128x128xf32, #tpu.memory_space<vmem>>, vector<1x128x128xf32>
    %27 = vector.shape_cast %26 : vector<1x128x128xf32> to vector<128x128xf32>
    %c1_28 = arith.constant 1 : index
    %c0_29 = arith.constant 0 : index
    %c0_30 = arith.constant 0 : index
    %28 = vector.load %arg4[%c1_28, %c0_29, %c0_30] : memref<2x128x256xf32, #tpu.memory_space<vmem>>, vector<1x128x256xf32>
    %29 = vector.shape_cast %28 : vector<1x128x256xf32> to vector<128x256xf32>
    %cst_31 = arith.constant dense<0.000000e+00> : vector<128x256xf32>
    %30 = tpu.matmul %23, %21, %cst_31 {dimension_numbers = #tpu.dot_dimension_numbers<[1], [0], [0], [1], [0, 0, 1, 1], [], []>} : vector<128x128xf32>, vector<128x256xf32>, vector<128x256xf32> -> vector<128x256xf32>
    %31 = arith.addf %30, %25 : vector<128x256xf32>
    %cst_32 = arith.constant 0.000000e+00 : f32
    %32 = vector.broadcast %cst_32 : f32 to vector<128x256xf32>
    %33 = arith.maximumf %31, %32 : vector<128x256xf32>
    %cst_33 = arith.constant dense<0.000000e+00> : vector<128x256xf32>
    %34 = tpu.matmul %27, %33, %cst_33 {dimension_numbers = #tpu.dot_dimension_numbers<[1], [0], [0], [1], [0, 0, 1, 1], [], []>} : vector<128x128xf32>, vector<128x256xf32>, vector<128x256xf32> -> vector<128x256xf32>
    %35 = arith.addf %34, %29 : vector<128x256xf32>
    %36 = arith.addf %35, %21 : vector<128x256xf32>
    %cst_34 = arith.constant 0.000000e+00 : f32
    %37 = vector.broadcast %cst_34 : f32 to vector<128x256xf32>
    %38 = arith.maximumf %36, %37 : vector<128x256xf32>
    %39 = vector.extract_strided_slice %38 {offsets = [0, 0], sizes = [128, 128], strides = [1, 1]} : vector<128x256xf32> to vector<128x128xf32>
    %c0_35 = arith.constant 0 : index
    %c0_36 = arith.constant 0 : index
    %c0_37 = arith.constant 0 : index
    %40 = vector.load %arg5[%c0_35, %c0_36, %c0_37] : memref<2x128x128xf32, #tpu.memory_space<vmem>>, vector<1x128x128xf32>
    %41 = vector.shape_cast %40 : vector<1x128x128xf32> to vector<128x128xf32>
    %42 = vector.shape_cast %39 : vector<128x128xf32> to vector<1x128x128xf32>
    tpu.vector_store %arg5[%c0_35, %c0_36, %c0_37], %42 {strides = array<i32>} : memref<2x128x128xf32, #tpu.memory_space<vmem>>, vector<1x128x128xf32>,
    %43 = vector.extract_strided_slice %38 {offsets = [0, 128], sizes = [128, 128], strides = [1, 1]} : vector<128x256xf32> to vector<128x128xf32>
    %c1_38 = arith.constant 1 : index
    %c0_39 = arith.constant 0 : index
    %c0_40 = arith.constant 0 : index
    %44 = vector.load %arg5[%c1_38, %c0_39, %c0_40] : memref<2x128x128xf32, #tpu.memory_space<vmem>>, vector<1x128x128xf32>
    %45 = vector.shape_cast %44 : vector<1x128x128xf32> to vector<128x128xf32>
    %46 = vector.shape_cast %43 : vector<128x128xf32> to vector<1x128x128xf32>
    tpu.vector_store %arg5[%c1_38, %c0_39, %c0_40], %46 {strides = array<i32>} : memref<2x128x128xf32, #tpu.memory_space<vmem>>, vector<1x128x128xf32>,
    return
  }
}

</mosaic_0001>

<bundles_post_ra>
// kernel: tpu_custom_call.1
= control target key start
LH: loop header
LB: loop body
LE: loop exit
PB: predicated region body
PF: predicated region fallthrough
CT: control target
= control target key end

     0   :  { %10 = vsyncpa [#allocation3], 0  ;;  %s1840_s0 = inlined_call_operand.hbm [shape: f32[2,128,128], index: 0, kind: input, shape index: {}]   ;;  %s1841_s1 = inlined_call_operand.hbm [shape: f32[2,128,128], index: 1, kind: input, shape index: {}]   ;;  %s1842_s2 = inlined_call_operand.hbm [shape: f32[2,128,256], index: 2, kind: input, shape index: {}]   ;;  %s1843_s3 = inlined_call_operand.hbm [shape: f32[2,128,128], index: 3, kind: input, shape index: {}]   ;;  %s1844_s4 = inlined_call_operand.hbm [shape: f32[2,128,256], index: 4, kind: input, shape index: {}]   ;;  %s1845_s5 = inlined_call_operand.hbm [shape: f32[2,128,128], index: 5, kind: output, shape index: {}]  }
   0x1   :  { %11 = vsyncpa [#allocation6], 0 }
   0x2   :  { %12 = vsyncpa [#allocation9], 0 }
   0x3   :  { %13 = vsyncpa [#allocation4], 0  ;;  %s31_s20 = sshll.u32 %s1841_s1, 4  ;;  %s1256_s21 = smov [#allocation5]   ;;  %s32_s20 = int_to_ptr.hbm [resolvable:$true] %s31_s20 }
   0x4   :  { %s33_s22 = sshll.u32 %s1256_s21, 4  ;;  %s57_s25 = sshll.u32 %s1843_s3, 4  ;;  %s34_s22 = int_to_ptr.vmem [resolvable:$true] %s33_s22  ;;  %s58_s25 = int_to_ptr.hbm [resolvable:$true] %s57_s25 }
   0x5   :  { %s1257_s26 = smov 128   ;;  %s1258_s27 = smov 8  }
   0x6   :  { %39 = dma.hbm_to_vmem [thread:$0]  %s32_s20, 4096, %s34_s22, [#allocation6], %s1257_s26, %s1257_s26, %s1258_s27  }
   0x7   :  { %s1259_s28 = smov [#allocation8]   ;;  %s18_s1 = sshll.u32 %s1840_s0, 4  ;;  %s19_s1 = int_to_ptr.hbm [resolvable:$true] %s18_s1 }
   0x8   :  { %s59_s29 = sshll.u32 %s1259_s28, 4  ;;  %s44_s8 = sshll.u32 %s1842_s2, 4  ;;  %s60_s29 = int_to_ptr.vmem [resolvable:$true] %s59_s29  ;;  %s45_s8 = int_to_ptr.hbm [resolvable:$true] %s44_s8 }
   0x9   :  { %65 = dma.hbm_to_vmem [thread:$0]  %s58_s25, 4096, %s60_s29, [#allocation9], %s1257_s26, %s1257_s26, %s1258_s27  }
   0xa   :  { %s1260_s9 = smov [#allocation2]   ;;  %s1261_s11 = smov [#allocation7]  }
   0xb   :  { %s20_s10 = sshll.u32 %s1260_s9, 4  ;;  %s46_s0 = sshll.u32 %s1261_s11, 4  ;;  %s21_s10 = int_to_ptr.vmem [resolvable:$true] %s20_s10  ;;  %s47_s0 = int_to_ptr.vmem [resolvable:$true] %s46_s0 }
   0xc   :  { %26 = dma.hbm_to_vmem [thread:$0]  %s19_s1, 4096, %s21_s10, [#allocation3], %s1257_s26, %s1257_s26, %s1258_s27  }
   0xd   :  { %s1262_s12 = smov 256   ;;  %s1263_s13 = smov 16  }
   0xe   :  { %52 = dma.hbm_to_vmem [thread:$0]  %s45_s8, 8192, %s47_s0, [#allocation6], %s1262_s12, %s1262_s12, %s1263_s13  }
   0xf   :  { %s70_s16 = sshll.u32 %s1844_s4, 4  ;;  %s1264_s2 = smov [#allocation10]   ;;  %s71_s16 = int_to_ptr.hbm [resolvable:$true] %s70_s16 }
  0x10   :  { %s72_s17 = sshll.u32 %s1264_s2, 4  ;;  %s73_s17 = int_to_ptr.vmem [resolvable:$true] %s72_s17 }
  0x11   :  { %78 = dma.hbm_to_vmem [thread:$0]  %s71_s16, 8192, %s73_s17, [#allocation9], %s1262_s12, %s1262_s12, %s1263_s13  }
  0x12   :  { %1248 = dma.done.wait [#allocation3], 4096  }
  0x13   :  { %1249 = vsyncadd [#allocation3], 4294963200 }
  0x14   :  { %1250 = dma.done.wait [#allocation6], 12288  }
  0x15   :  { %1251 = vsyncadd [#allocation6], 4294955008 }
  0x16   :  { %1252 = dma.done.wait [#allocation9], 12288  }
  0x17   :  { %1253 = vsyncadd [#allocation9], 4294955008  ;;  %v1320_v0 = vld [vmem:[#allocation2 + $0x78] sm:$0xff]  ;;  %v1324_v2 = vld [vmem:[#allocation2 + $0x70] sm:$0xff]  ;;  %s1265_s4 = smov [#allocation11]   ;;  %s1079_s21 = sshll.u32 %s1845_s5, 4  ;;  %s1080_s21 = int_to_ptr.hbm [resolvable:$true] %s1079_s21 }
  0x18   :  { %v1322_v1 = vld [vmem:[#allocation2 + $0xf8] sm:$0xff]  ;;  %228 = vmatpush.msra.mxu0 %v1320_v0  ;;  %v1328_v3 = vld [vmem:[#allocation2 + $0xf0] sm:$0xff]  ;;  %v1330_v4 = vld [vmem:[#allocation2 + $0x68] sm:$0xff]  ;;  %s1077_s18 = sshll.u32 %s1265_s4, 4  ;;  %s1078_s18 = int_to_ptr.vmem [resolvable:$true] %s1077_s18 }
  0x19   :  { %293 = vmatpush.msra.mxu1 %v1322_v1  ;;  %v1332_v5 = vld [vmem:[#allocation2 + $0xe8] sm:$0xff]  ;;  %v1336_v6 = vld [vmem:[#allocation2 + $0x60] sm:$0xff]  ;;  %v1342_v8 = vld [vmem:[#allocation2 + $0x58] sm:$0xff] }
  0x1a   :  { %229 = vmatpush.msra.mxu0 %v1324_v2  ;;  %v1338_v7 = vld [vmem:[#allocation2 + $0xe0] sm:$0xff]  ;;  %1926 = vst [vmem:[#allocation16_spill] sm:$0xff] %v1342_v8  ;;  %v1344_v9 = vld [vmem:[#allocation2 + $0xd8] sm:$0xff]  ;;  %v1348_v10 = vld [vmem:[#allocation2 + $0x50] sm:$0xff] }
  0x1b   :  { %294 = vmatpush.msra.mxu1 %v1328_v3  ;;  %1927 = vst [vmem:[#allocation17_spill] sm:$0xff] %v1344_v9  ;;  %v1350_v11 = vld [vmem:[#allocation2 + $0xd0] sm:$0xff]  ;;  %v1354_v12 = vld [vmem:[#allocation2 + $0x48] sm:$0xff]  ;;  %v1360_v14 = vld [vmem:[#allocation2 + $0x40] sm:$0xff] }
  0x1c   :  { %230 = vmatpush.msra.mxu0 %v1330_v4  ;;  %1928 = vst [vmem:[#allocation18_spill] sm:$0xff] %v1348_v10  ;;  %v1356_v13 = vld [vmem:[#allocation2 + $0xc8] sm:$0xff]  ;;  %v1362_v15 = vld [vmem:[#allocation2 + $0xc0] sm:$0xff]  ;;  %v1366_v16 = vld [vmem:[#allocation2 + $0x38] sm:$0xff] }
  0x1d   :  { %295 = vmatpush.msra.mxu1 %v1332_v5  ;;  %1929 = vst [vmem:[#allocation19_spill] sm:$0xff] %v1350_v11  ;;  %v1368_v17 = vld [vmem:[#allocation2 + $0xb8] sm:$0xff]  ;;  %v1372_v18 = vld [vmem:[#allocation2 + $0x30] sm:$0xff]  ;;  %v1378_v20 = vld [vmem:[#allocation2 + $0x28] sm:$0xff] }
  0x1e   :  { %231 = vmatpush.msra.mxu0 %v1336_v6  ;;  %1930 = vst [vmem:[#allocation20_spill] sm:$0xff] %v1354_v12  ;;  %v1374_v19 = vld [vmem:[#allocation2 + $0xb0] sm:$0xff]  ;;  %v1380_v21 = vld [vmem:[#allocation2 + $0xa8] sm:$0xff]  ;;  %v1384_v22 = vld [vmem:[#allocation2 + $0x20] sm:$0xff] }
  0x1f   :  { %296 = vmatpush.msra.mxu1 %v1338_v7  ;;  %1931 = vst [vmem:[#allocation21_spill] sm:$0xff] %v1356_v13  ;;  %v1386_v23 = vld [vmem:[#allocation2 + $0xa0] sm:$0xff]  ;;  %v1390_v24 = vld [vmem:[#allocation2 + $0x18] sm:$0xff]  ;;  %v1396_v26 = vld [vmem:[#allocation2 + $0x10] sm:$0xff] }
  0x20   :  { %232 = vmatpush.msra.mxu0 %v1342_v8  ;;  %1932 = vst [vmem:[#allocation22_spill] sm:$0xff] %v1360_v14  ;;  %v1392_v25 = vld [vmem:[#allocation2 + $0x98] sm:$0xff]  ;;  %v1398_v27 = vld [vmem:[#allocation2 + $0x90] sm:$0xff]  ;;  %v1402_v28 = vld [vmem:[#allocation2 + $0x8] sm:$0xff] }
  0x21   :  { %297 = vmatpush.msra.mxu1 %v1344_v9  ;;  %1933 = vst [vmem:[#allocation23_spill] sm:$0xff] %v1362_v15  ;;  %v1404_v29 = vld [vmem:[#allocation2 + $0x88] sm:$0xff]  ;;  %v1408_v30 = vld [vmem:[#allocation2] sm:$0xff]  ;;  %v134_v34 = vld [vmem:[#allocation5 + $0x10] sm:$0xff] }
  0x22   :  { %233 = vmatpush.msra.mxu0 %v1348_v10  ;;  %1934 = vst [vmem:[#allocation24_spill] sm:$0xff] %v1366_v16  ;;  %v1410_v31 = vld [vmem:[#allocation2 + $0x80] sm:$0xff]  ;;  %v133_v33 = vld [vmem:[#allocation5 + $0x8] sm:$0xff]  ;;  %v135_v35 = vld [vmem:[#allocation5 + $0x18] sm:$0xff] }
  0x23   :  { %298 = vmatpush.msra.mxu1 %v1350_v11  ;;  %1935 = vst [vmem:[#allocation25_spill] sm:$0xff] %v1368_v17  ;;  %v132_v32 = vld [vmem:[#allocation5] sm:$0xff]  ;;  %v137_v37 = vld [vmem:[#allocation5 + $0x28] sm:$0xff]  ;;  %v138_v38 = vld [vmem:[#allocation5 + $0x30] sm:$0xff] }
  0x24   :  { %234 = vmatpush.msra.mxu0 %v1354_v12  ;;  %1936 = vst [vmem:[#allocation26_spill] sm:$0xff] %v1372_v18  ;;  %v136_v36 = vld [vmem:[#allocation5 + $0x20] sm:$0xff]  ;;  %v139_v39 = vld [vmem:[#allocation5 + $0x38] sm:$0xff]  ;;  %v141_v41 = vld [vmem:[#allocation5 + $0x48] sm:$0xff] }
  0x25   :  { %299 = vmatpush.msra.mxu1 %v1356_v13  ;;  %1937 = vst [vmem:[#allocation27_spill] sm:$0xff] %v1374_v19  ;;  %v140_v40 = vld [vmem:[#allocation5 + $0x40] sm:$0xff]  ;;  %v142_v42 = vld [vmem:[#allocation5 + $0x50] sm:$0xff]  ;;  %v143_v43 = vld [vmem:[#allocation5 + $0x58] sm:$0xff] }
  0x26   :  { %235 = vmatpush.msra.mxu0 %v1360_v14  ;;  %1938 = vst [vmem:[#allocation28_spill] sm:$0xff] %v1378_v20  ;;  %v144_v44 = vld [vmem:[#allocation5 + $0x60] sm:$0xff]  ;;  %v145_v45 = vld [vmem:[#allocation5 + $0x68] sm:$0xff]  ;;  %v146_v46 = vld [vmem:[#allocation5 + $0x70] sm:$0xff] }
  0x27   :  { %300 = vmatpush.msra.mxu1 %v1362_v15  ;;  %1939 = vst [vmem:[#allocation29_spill] sm:$0xff] %v1380_v21  ;;  %v147_v47 = vld [vmem:[#allocation5 + $0x78] sm:$0xff]  ;;  %v170_v15 = vld [vmem:[#allocation7 + $0xb0] sm:$0xff]  ;;  %v168_v9 = vld [vmem:[#allocation7 + $0xa0] sm:$0xff] }
  0x28   :  { %236 = vmatpush.msra.mxu0 %v1366_v16  ;;  %1940 = vst [vmem:[#allocation30_spill] sm:$0xff] %v1384_v22  ;;  %v171_v14 = vld [vmem:[#allocation7 + $0xb8] sm:$0xff]  ;;  %v169_v8 = vld [vmem:[#allocation7 + $0xa8] sm:$0xff] }
  0x29   :  { %301 = vmatpush.msra.mxu1 %v1368_v17  ;;  %1941 = vst [vmem:[#allocation31_spill] sm:$0xff] %v1386_v23 }
  0x2a   :  { %237 = vmatpush.msra.mxu0 %v1372_v18  ;;  %1942 = vst [vmem:[#allocation32_spill] sm:$0xff] %v1390_v24 }
  0x2b   :  { %302 = vmatpush.msra.mxu1 %v1374_v19  ;;  %1943 = vst [vmem:[#allocation33_spill] sm:$0xff] %v1392_v25 }
  0x2c   :  { %238 = vmatpush.msra.mxu0 %v1378_v20  ;;  %1944 = vst [vmem:[#allocation34_spill] sm:$0xff] %v1396_v26  ;;  %v173_v20 = vld [vmem:[#allocation7 + $0xc8] sm:$0xff] }
  0x2d   :  { %303 = vmatpush.msra.mxu1 %v1380_v21  ;;  %1945 = vst [vmem:[#allocation35_spill] sm:$0xff] %v1398_v27  ;;  %v172_v21 = vld [vmem:[#allocation7 + $0xc0] sm:$0xff] }
  0x2e   :  { %239 = vmatpush.msra.mxu0 %v1384_v22  ;;  %1946 = vst [vmem:[#allocation36_spill] sm:$0xff] %v1402_v28 }
  0x2f   :  { %304 = vmatpush.msra.mxu1 %v1386_v23  ;;  %1947 = vst [vmem:[#allocation37_spill] sm:$0xff] %v1404_v29 }
  0x30   :  { %240 = vmatpush.msra.mxu0 %v1390_v24  ;;  %1948 = vst [vmem:[#allocation38_spill] sm:$0xff] %v1408_v30 }
  0x31   :  { %305 = vmatpush.msra.mxu1 %v1392_v25  ;;  %1949 = vst [vmem:[#allocation39_spill] sm:$0xff] %v1410_v31 }
  0x32   :  { %241 = vmatpush.msra.mxu0 %v1396_v26 }
  0x33   :  { %306 = vmatpush.msra.mxu1 %v1398_v27 }
  0x34   :  { %242 = vmatpush.msra.mxu0 %v1402_v28  ;;  %v175_v28 = vld [vmem:[#allocation7 + $0xd8] sm:$0xff] }
  0x35   :  { %307 = vmatpush.msra.mxu1 %v1404_v29  ;;  %v174_v29 = vld [vmem:[#allocation7 + $0xd0] sm:$0xff] }
  0x36   :  { %243 = vmatpush.msra.mxu0 %v1408_v30  ;;  %v179_v30 = vld [vmem:[#allocation7 + $0xf8] sm:$0xff] }
  0x37   :  { %308 = vmatpush.msra.mxu1 %v1410_v31  ;;  %244 = vmatmul.f32.vlgmr.msra.gmra.mxu0 %v132_v32  ;;  %v178_v31 = vld [vmem:[#allocation7 + $0xf0] sm:$0xff] }
  0x38   :  { %309 = vmatmul.f32.vlgmr.msra.gmra.mxu1 %v132_v32 }
  0x3f   :  { %247 = vmatmul.f32.gmra.mxu0 %v133_v33 }
  0x40   :  { %312 = vmatmul.f32.gmra.mxu1 %v133_v33 }
  0x47   :  { %250 = vmatmul.f32.gmra.mxu0 %v134_v34 }
  0x48   :  { %315 = vmatmul.f32.gmra.mxu1 %v134_v34 }
  0x4f   :  { %253 = vmatmul.f32.gmra.mxu0 %v135_v35 }
  0x50   :  { %318 = vmatmul.f32.gmra.mxu1 %v135_v35 }
  0x57   :  { %256 = vmatmul.f32.gmra.mxu0 %v136_v36 }
  0x58   :  { %321 = vmatmul.f32.gmra.mxu1 %v136_v36 }
  0x5f   :  { %259 = vmatmul.f32.gmra.mxu0 %v137_v37 }
  0x60   :  { %324 = vmatmul.f32.gmra.mxu1 %v137_v37 }
  0x67   :  { %262 = vmatmul.f32.gmra.mxu0 %v138_v38 }
  0x68   :  { %327 = vmatmul.f32.gmra.mxu1 %v138_v38 }
  0x6f   :  { %265 = vmatmul.f32.gmra.mxu0 %v139_v39 }
  0x70   :  { %330 = vmatmul.f32.gmra.mxu1 %v139_v39 }
  0x77   :  { %268 = vmatmul.f32.gmra.mxu0 %v140_v40 }
  0x78   :  { %333 = vmatmul.f32.gmra.mxu1 %v140_v40 }
  0x7f   :  { %271 = vmatmul.f32.gmra.mxu0 %v141_v41 }
  0x80   :  { %336 = vmatmul.f32.gmra.mxu1 %v141_v41 }
  0x87   :  { %274 = vmatmul.f32.gmra.mxu0 %v142_v42 }
  0x88   :  { %339 = vmatmul.f32.gmra.mxu1 %v142_v42 }
  0x8f   :  { %277 = vmatmul.f32.gmra.mxu0 %v143_v43 }
  0x90   :  { %342 = vmatmul.f32.gmra.mxu1 %v143_v43 }
  0x97   :  { %280 = vmatmul.f32.gmra.mxu0 %v144_v44 }
  0x98   :  { %345 = vmatmul.f32.gmra.mxu1 %v144_v44 }
  0x9f   :  { %283 = vmatmul.f32.gmra.mxu0 %v145_v45 }
  0xa0   :  { %348 = vmatmul.f32.gmra.mxu1 %v145_v45 }
  0xa7   :  { %286 = vmatmul.f32.gmra.mxu0 %v146_v46 }
  0xa8   :  { %351 = vmatmul.f32.gmra.mxu1 %v146_v46  ;;  %v176_v46 = vld [vmem:[#allocation7 + $0xe0] sm:$0xff] }
  0xaf   :  { %289 = vmatmul.f32.gmra.mxu0 %v147_v47 }
  0xb0   :  { %354 = vmatmul.f32.gmra.mxu1 %v147_v47  ;;  %v177_v47 = vld [vmem:[#allocation7 + $0xe8] sm:$0xff] }
  0xb4   :  { %v1416_v48 = vpop.f32.mrf.mxu0 }
  0xb5   :  { %v1418_v49 = vpop.f32.mrf.mxu1 }
  0xbc   :  { %v1420_v50 = vpop.f32.mrf.mxu0 }
  0xbd   :  { %v1422_v51 = vpop.f32.mrf.mxu1 }
  0xc4   :  { %v1424_v52 = vpop.f32.mrf.mxu0 }
  0xc5   :  { %v1426_v53 = vpop.f32.mrf.mxu1 }
  0xcc   :  { %v1428_v54 = vpop.f32.mrf.mxu0 }
  0xcd   :  { %v1430_v55 = vpop.f32.mrf.mxu1 }
  0xd4   :  { %v1432_v56 = vpop.f32.mrf.mxu0 }
  0xd5   :  { %v1434_v57 = vpop.f32.mrf.mxu1 }
  0xdc   :  { %v1436_v58 = vpop.f32.mrf.mxu0 }
  0xdd   :  { %v1438_v59 = vpop.f32.mrf.mxu1 }
  0xe4   :  { %v1440_v60 = vpop.f32.mrf.mxu0 }
  0xe5   :  { %v1442_v61 = vpop.f32.mrf.mxu1 }
  0xec   :  { %v1444_v62 = vpop.f32.mrf.mxu0 }
  0xed   :  { %v1446_v63 = vpop.f32.mrf.mxu1 }
  0xf4   :  { %v1448_v32 = vpop.f32.mrf.mxu0 }
  0xf5   :  { %v1450_v33 = vpop.f32.mrf.mxu1 }
  0xfc   :  { %v272_v34 = vpop.f32.mrf.mxu0 }
  0xfd   :  { %v337_v35 = vpop.f32.mrf.mxu1 }
 0x104   :  { %v275_v36 = vpop.f32.mrf.mxu0 }
 0x105   :  { %v340_v37 = vpop.f32.mrf.mxu1 }
 0x10c   :  { %v278_v38 = vpop.f32.mrf.mxu0 }
 0x10d   :  { %v343_v39 = vpop.f32.mrf.mxu1 }
 0x114   :  { %v281_v40 = vpop.f32.mrf.mxu0 }
 0x115   :  { %v346_v41 = vpop.f32.mrf.mxu1  ;;  %v282_v13 = vadd.f32 %v281_v40, %v172_v21  ;;  %v165_v21 = vld [vmem:[#allocation7 + $0x88] sm:$0xff]  ;;  %v156_v40 = vld [vmem:[#allocation7 + $0x40] sm:$0xff] }
 0x116   :  { %v347_v12 = vadd.f32 %v346_v41, %v173_v20  ;;  %v164_v20 = vld [vmem:[#allocation7 + $0x80] sm:$0xff]  ;;  %v157_v41 = vld [vmem:[#allocation7 + $0x48] sm:$0xff] }
 0x11c   :  { %v284_v42 = vpop.f32.mrf.mxu0 }
 0x11d   :  { %v349_v43 = vpop.f32.mrf.mxu1  ;;  %v285_v19 = vadd.f32 %v284_v42, %v174_v29  ;;  %v166_v29 = vld [vmem:[#allocation7 + $0x90] sm:$0xff] }
 0x11e   :  { %v350_v18 = vadd.f32 %v349_v43, %v175_v28  ;;  %v167_v28 = vld [vmem:[#allocation7 + $0x98] sm:$0xff] }
 0x124   :  { %v287_v44 = vpop.f32.mrf.mxu0 }
 0x125   :  { %v352_v45 = vpop.f32.mrf.mxu1  ;;  %v288_v25 = vadd.f32 %v287_v44, %v176_v46  ;;  %v279_v44 = vadd.f32 %v278_v38, %v170_v15  ;;  %v163_v15 = vld [vmem:[#allocation7 + $0x78] sm:$0xff]  ;;  %v154_v46 = vld [vmem:[#allocation7 + $0x30] sm:$0xff] }
 0x126   :  { %v353_v24 = vadd.f32 %v352_v45, %v177_v47  ;;  %v344_v45 = vadd.f32 %v343_v39, %v171_v14  ;;  %v162_v14 = vld [vmem:[#allocation7 + $0x70] sm:$0xff]  ;;  %v155_v47 = vld [vmem:[#allocation7 + $0x38] sm:$0xff] }
 0x127   :  { %v386_v11 = vmax.f32 %v288_v25, 0.0 }
 0x128   :  { %v387_v10 = vmax.f32 %v353_v24, 0.0  ;;  %v380_v24 = vmax.f32 %v279_v44, 0.0  ;;  %v381_v25 = vmax.f32 %v344_v45, 0.0 }
 0x12c   :  { %v290_v27 = vpop.f32.mrf.mxu0 }
 0x12d   :  { %v355_v26 = vpop.f32.mrf.mxu1  ;;  %v291_v23 = vadd.f32 %v290_v27, %v178_v31  ;;  %v384_v27 = vmax.f32 %v285_v19, 0.0  ;;  %v383_v31 = vmax.f32 %v347_v12, 0.0  ;;  %v160_v12 = vld [vmem:[#allocation7 + $0x60] sm:$0xff]  ;;  %v332_v19 = vadd.f32 %v1446_v63, %v163_v15 }
 0x12e   :  { %v356_v22 = vadd.f32 %v355_v26, %v179_v30  ;;  %v385_v26 = vmax.f32 %v350_v18, 0.0  ;;  %v382_v30 = vmax.f32 %v282_v13, 0.0  ;;  %v161_v13 = vld [vmem:[#allocation7 + $0x68] sm:$0xff]  ;;  %v267_v18 = vadd.f32 %v1444_v62, %v162_v14 }
 0x12f   :  { %v388_v17 = vmax.f32 %v291_v23, 0.0  ;;  %v276_v23 = vadd.f32 %v275_v36, %v168_v9  ;;  %v158_v36 = vld [vmem:[#allocation7 + $0x50] sm:$0xff]  ;;  %v373_v43 = vmax.f32 %v332_v19, 0.0  ;;  %v189_v19 = vld [vmem:[#allocation8 + $0x48] sm:$0xff] }
 0x130   :  { %v389_v16 = vmax.f32 %v356_v22, 0.0  ;;  %v341_v22 = vadd.f32 %v340_v37, %v169_v8  ;;  %v159_v37 = vld [vmem:[#allocation7 + $0x58] sm:$0xff]  ;;  %v261_v62 = vadd.f32 %v1436_v58, %v158_v36  ;;  %v372_v42 = vmax.f32 %v267_v18, 0.0  ;;  %v188_v18 = vld [vmem:[#allocation8 + $0x40] sm:$0xff] }
 0x131   :  { %390 = vmatpush.msra.mxu2 %v388_v17  ;;  %v273_v17 = vadd.f32 %v272_v34, %v166_v29  ;;  %v378_v9 = vmax.f32 %v276_v23, 0.0  ;;  %v326_v63 = vadd.f32 %v1438_v59, %v159_v37  ;;  %v255_v58 = vadd.f32 %v1428_v54, %v154_v46  ;;  %v150_v23 = vld [vmem:[#allocation7 + $0x10] sm:$0xff]  ;;  %v192_v36 = vld [vmem:[#allocation8 + $0x60] sm:$0xff]  ;;  %v193_v37 = vld [vmem:[#allocation8 + $0x68] sm:$0xff] }
 0x132   :  { %455 = vmatpush.msra.mxu3 %v389_v16  ;;  %v338_v16 = vadd.f32 %v337_v35, %v167_v28  ;;  %v379_v8 = vmax.f32 %v341_v22, 0.0  ;;  %v320_v59 = vadd.f32 %v1430_v55, %v155_v47  ;;  %v368_v29 = vmax.f32 %v261_v62, 0.0  ;;  %v151_v22 = vld [vmem:[#allocation7 + $0x18] sm:$0xff] }
 0x133   :  { %391 = vmatpush.msra.mxu2 %v386_v11  ;;  %v335_v11 = vadd.f32 %v1450_v33, %v165_v21  ;;  %v376_v34 = vmax.f32 %v273_v17, 0.0  ;;  %v329_v33 = vadd.f32 %v1442_v61, %v161_v13  ;;  %v323_v61 = vadd.f32 %v1434_v57, %v157_v41  ;;  %v149_v21 = vld [vmem:[#allocation7 + $0x8] sm:$0xff]  ;;  %v187_v13 = vld [vmem:[#allocation8 + $0x38] sm:$0xff] }
 0x134   :  { %456 = vmatpush.msra.mxu3 %v387_v10  ;;  %v270_v10 = vadd.f32 %v1448_v32, %v164_v20  ;;  %v377_v35 = vmax.f32 %v338_v16, 0.0  ;;  %v264_v32 = vadd.f32 %v1440_v60, %v160_v12  ;;  %v258_v60 = vadd.f32 %v1432_v56, %v156_v40  ;;  %v148_v20 = vld [vmem:[#allocation7] sm:$0xff]  ;;  %v186_v12 = vld [vmem:[#allocation8 + $0x30] sm:$0xff] }
 0x135   :  { %392 = vmatpush.msra.mxu2 %v384_v27  ;;  %v375_v39 = vmax.f32 %v335_v11, 0.0  ;;  %v371_v45 = vmax.f32 %v329_v33, 0.0  ;;  %v152_v27 = vld [vmem:[#allocation7 + $0x20] sm:$0xff]  ;;  %v369_v28 = vmax.f32 %v326_v63, 0.0  ;;  %v249_v54 = vadd.f32 %v1420_v50, %v150_v23  ;;  %v183_v11 = vld [vmem:[#allocation8 + $0x18] sm:$0xff] }
 0x136   :  { %457 = vmatpush.msra.mxu3 %v385_v26  ;;  %v374_v38 = vmax.f32 %v270_v10, 0.0  ;;  %v370_v44 = vmax.f32 %v264_v32, 0.0  ;;  %v153_v26 = vld [vmem:[#allocation7 + $0x28] sm:$0xff]  ;;  %v252_v56 = vadd.f32 %v1424_v52, %v152_v27  ;;  %v314_v55 = vadd.f32 %v1422_v51, %v151_v22  ;;  %v180_v10 = vld [vmem:[#allocation8] sm:$0xff]  ;;  %v194_v32 = vld [vmem:[#allocation8 + $0x70] sm:$0xff] }
 0x137   :  { %393 = vmatpush.msra.mxu2 %v382_v30  ;;  %v317_v57 = vadd.f32 %v1426_v53, %v153_v26  ;;  %v366_v30 = vmax.f32 %v258_v60, 0.0  ;;  %v364_v17 = vmax.f32 %v255_v58, 0.0  ;;  %v365_v16 = vmax.f32 %v320_v59, 0.0  ;;  %v195_v33 = vld [vmem:[#allocation8 + $0x78] sm:$0xff] }
 0x138   :  { %458 = vmatpush.msra.mxu3 %v383_v31  ;;  %v367_v31 = vmax.f32 %v323_v61, 0.0  ;;  %v311_v52 = vadd.f32 %v1418_v49, %v149_v21  ;;  %v362_v53 = vmax.f32 %v252_v56, 0.0  ;;  %v360_v14 = vmax.f32 %v249_v54, 0.0  ;;  %v182_v49 = vld [vmem:[#allocation8 + $0x10] sm:$0xff] }
 0x139   :  { %394 = vmatpush.msra.mxu2 %v380_v24  ;;  %v246_v24 = vadd.f32 %v1416_v48, %v148_v20  ;;  %v361_v15 = vmax.f32 %v314_v55, 0.0  ;;  %v181_v48 = vld [vmem:[#allocation8 + $0x8] sm:$0xff] }
 0x13a   :  { %459 = vmatpush.msra.mxu3 %v381_v25  ;;  %v363_v25 = vmax.f32 %v317_v57, 0.0  ;;  %v359_v51 = vmax.f32 %v311_v52, 0.0  ;;  %v223_v52 = vld [vmem:[#allocation10 + $0xd8] sm:$0xff] }
 0x13b   :  { %395 = vmatpush.msra.mxu2 %v378_v9  ;;  %v358_v50 = vmax.f32 %v246_v24, 0.0  ;;  %v184_v9 = vld [vmem:[#allocation8 + $0x20] sm:$0xff]  ;;  %v222_v24 = vld [vmem:[#allocation10 + $0xd0] sm:$0xff] }
 0x13c   :  { %460 = vmatpush.msra.mxu3 %v379_v8  ;;  %v185_v8 = vld [vmem:[#allocation8 + $0x28] sm:$0xff] }
 0x13d   :  { %396 = vmatpush.msra.mxu2 %v376_v34  ;;  %v190_v34 = vld [vmem:[#allocation8 + $0x50] sm:$0xff] }
 0x13e   :  { %461 = vmatpush.msra.mxu3 %v377_v35  ;;  %v191_v35 = vld [vmem:[#allocation8 + $0x58] sm:$0xff] }
 0x13f   :  { %397 = vmatpush.msra.mxu2 %v374_v38 }
 0x140   :  { %462 = vmatpush.msra.mxu3 %v375_v39 }
 0x141   :  { %398 = vmatpush.msra.mxu2 %v372_v42 }
 0x142   :  { %463 = vmatpush.msra.mxu3 %v373_v43 }
 0x143   :  { %399 = vmatpush.msra.mxu2 %v370_v44 }
 0x144   :  { %464 = vmatpush.msra.mxu3 %v371_v45 }
 0x145   :  { %400 = vmatpush.msra.mxu2 %v368_v29 }
 0x146   :  { %465 = vmatpush.msra.mxu3 %v369_v28 }
 0x147   :  { %401 = vmatpush.msra.mxu2 %v366_v30 }
 0x148   :  { %466 = vmatpush.msra.mxu3 %v367_v31 }
 0x149   :  { %402 = vmatpush.msra.mxu2 %v364_v17  ;;  %v224_v17 = vld [vmem:[#allocation10 + $0xe0] sm:$0xff] }
 0x14a   :  { %467 = vmatpush.msra.mxu3 %v365_v16  ;;  %v225_v16 = vld [vmem:[#allocation10 + $0xe8] sm:$0xff] }
 0x14b   :  { %403 = vmatpush.msra.mxu2 %v362_v53  ;;  %v226_v53 = vld [vmem:[#allocation10 + $0xf0] sm:$0xff] }
 0x14c   :  { %468 = vmatpush.msra.mxu3 %v363_v25  ;;  %v227_v25 = vld [vmem:[#allocation10 + $0xf8] sm:$0xff] }
 0x14d   :  { %404 = vmatpush.msra.mxu2 %v360_v14  ;;  %v220_v14 = vld [vmem:[#allocation10 + $0xc0] sm:$0xff] }
 0x14e   :  { %469 = vmatpush.msra.mxu3 %v361_v15  ;;  %v221_v15 = vld [vmem:[#allocation10 + $0xc8] sm:$0xff] }
 0x14f   :  { %405 = vmatpush.msra.mxu2 %v358_v50 }
 0x150   :  { %470 = vmatpush.msra.mxu3 %v359_v51  ;;  %406 = vmatmul.f32.vlgmr.msra.gmra.mxu2 %v180_v10 }
 0x151   :  { %471 = vmatmul.f32.vlgmr.msra.gmra.mxu3 %v180_v10 }
 0x158   :  { %409 = vmatmul.f32.gmra.mxu2 %v181_v48 }
 0x159   :  { %474 = vmatmul.f32.gmra.mxu3 %v181_v48 }
 0x160   :  { %412 = vmatmul.f32.gmra.mxu2 %v182_v49 }
 0x161   :  { %477 = vmatmul.f32.gmra.mxu3 %v182_v49  ;;  %v218_v49 = vld [vmem:[#allocation10 + $0xb0] sm:$0xff] }
 0x168   :  { %415 = vmatmul.f32.gmra.mxu2 %v183_v11 }
 0x169   :  { %480 = vmatmul.f32.gmra.mxu3 %v183_v11  ;;  %v219_v11 = vld [vmem:[#allocation10 + $0xb8] sm:$0xff] }
 0x170   :  { %418 = vmatmul.f32.gmra.mxu2 %v184_v9 }
 0x171   :  { %483 = vmatmul.f32.gmra.mxu3 %v184_v9 }
 0x178   :  { %421 = vmatmul.f32.gmra.mxu2 %v185_v8 }
 0x179   :  { %486 = vmatmul.f32.gmra.mxu3 %v185_v8 }
 0x180   :  { %424 = vmatmul.f32.gmra.mxu2 %v186_v12 }
 0x181   :  { %489 = vmatmul.f32.gmra.mxu3 %v186_v12 }
 0x188   :  { %427 = vmatmul.f32.gmra.mxu2 %v187_v13 }
 0x189   :  { %492 = vmatmul.f32.gmra.mxu3 %v187_v13 }
 0x190   :  { %430 = vmatmul.f32.gmra.mxu2 %v188_v18 }
 0x191   :  { %495 = vmatmul.f32.gmra.mxu3 %v188_v18 }
 0x198   :  { %433 = vmatmul.f32.gmra.mxu2 %v189_v19 }
 0x199   :  { %498 = vmatmul.f32.gmra.mxu3 %v189_v19 }
 0x1a0   :  { %436 = vmatmul.f32.gmra.mxu2 %v190_v34 }
 0x1a1   :  { %501 = vmatmul.f32.gmra.mxu3 %v190_v34  ;;  %v216_v34 = vld [vmem:[#allocation10 + $0xa0] sm:$0xff] }
 0x1a8   :  { %439 = vmatmul.f32.gmra.mxu2 %v191_v35 }
 0x1a9   :  { %504 = vmatmul.f32.gmra.mxu3 %v191_v35  ;;  %v217_v35 = vld [vmem:[#allocation10 + $0xa8] sm:$0xff] }
 0x1b0   :  { %442 = vmatmul.f32.gmra.mxu2 %v192_v36 }
 0x1b1   :  { %507 = vmatmul.f32.gmra.mxu3 %v192_v36 }
 0x1b8   :  { %445 = vmatmul.f32.gmra.mxu2 %v193_v37 }
 0x1b9   :  { %510 = vmatmul.f32.gmra.mxu3 %v193_v37 }
 0x1c0   :  { %448 = vmatmul.f32.gmra.mxu2 %v194_v32 }
 0x1c1   :  { %513 = vmatmul.f32.gmra.mxu3 %v194_v32 }
 0x1c8   :  { %451 = vmatmul.f32.gmra.mxu2 %v195_v33 }
 0x1c9   :  { %516 = vmatmul.f32.gmra.mxu3 %v195_v33 }
 0x1d3   :  { %v1470_v38 = vpop.f32.mrf.mxu2 }
 0x1d4   :  { %v1472_v39 = vpop.f32.mrf.mxu3 }
 0x1db   :  { %v1474_v40 = vpop.f32.mrf.mxu2 }
 0x1dc   :  { %v1476_v41 = vpop.f32.mrf.mxu3 }
 0x1e3   :  { %v1478_v62 = vpop.f32.mrf.mxu2 }
 0x1e4   :  { %v1480_v63 = vpop.f32.mrf.mxu3 }
 0x1eb   :  { %v1482_v42 = vpop.f32.mrf.mxu2 }
 0x1ec   :  { %v1484_v43 = vpop.f32.mrf.mxu3 }
 0x1f3   :  { %v1486_v46 = vpop.f32.mrf.mxu2 }
 0x1f4   :  { %v1488_v47 = vpop.f32.mrf.mxu3 }
 0x1fb   :  { %v1490_v60 = vpop.f32.mrf.mxu2 }
 0x1fc   :  { %v1492_v61 = vpop.f32.mrf.mxu3 }
 0x203   :  { %v1494_v44 = vpop.f32.mrf.mxu2 }
 0x204   :  { %v1496_v45 = vpop.f32.mrf.mxu3 }
 0x20b   :  { %v1498_v27 = vpop.f32.mrf.mxu2 }
 0x20c   :  { %v1500_v26 = vpop.f32.mrf.mxu3 }
 0x213   :  { %v1502_v58 = vpop.f32.mrf.mxu2 }
 0x214   :  { %v1504_v59 = vpop.f32.mrf.mxu3 }
 0x21b   :  { %v434_v29 = vpop.f32.mrf.mxu2 }
 0x21c   :  { %v499_v28 = vpop.f32.mrf.mxu3 }
 0x223   :  { %v437_v23 = vpop.f32.mrf.mxu2 }
 0x224   :  { %v502_v22 = vpop.f32.mrf.mxu3 }
 0x22b   :  { %v440_v56 = vpop.f32.mrf.mxu2 }
 0x22c   :  { %v505_v57 = vpop.f32.mrf.mxu3 }
 0x233   :  { %v443_v30 = vpop.f32.mrf.mxu2 }
 0x234   :  { %v508_v31 = vpop.f32.mrf.mxu3  ;;  %v444_v18 = vadd.f32 %v443_v30, %v220_v14  ;;  %v1958_v14 = vld [vmem:[#allocation16_spill] sm:$0xff] }
 0x235   :  { %v509_v19 = vadd.f32 %v508_v31, %v221_v15  ;;  %v1960_v15 = vld [vmem:[#allocation17_spill] sm:$0xff] }
 0x23b   :  { %v446_v20 = vpop.f32.mrf.mxu2 }
 0x23c   :  { %v511_v21 = vpop.f32.mrf.mxu3  ;;  %v447_v9 = vadd.f32 %v446_v20, %v222_v24  ;;  %v441_v20 = vadd.f32 %v440_v56, %v218_v49  ;;  %v213_v24 = vld [vmem:[#allocation10 + $0x88] sm:$0xff]  ;;  %v1962_v49 = vld [vmem:[#allocation18_spill] sm:$0xff] }
 0x23d   :  { %v512_v8 = vadd.f32 %v511_v21, %v223_v52  ;;  %v506_v21 = vadd.f32 %v505_v57, %v219_v11  ;;  %v210_v57 = vld [vmem:[#allocation10 + $0x70] sm:$0xff]  ;;  %v211_v52 = vld [vmem:[#allocation10 + $0x78] sm:$0xff] }
 0x243   :  { %v449_v54 = vpop.f32.mrf.mxu2 }
 0x244   :  { %v514_v55 = vpop.f32.mrf.mxu3  ;;  %v450_v50 = vadd.f32 %v449_v54, %v224_v17  ;;  %v214_v54 = vld [vmem:[#allocation10 + $0x90] sm:$0xff]  ;;  %v438_v17 = vadd.f32 %v437_v23, %v216_v34  ;;  %v1966_v34 = vld [vmem:[#allocation20_spill] sm:$0xff] }
 0x245   :  { %v515_v51 = vadd.f32 %v514_v55, %v225_v16  ;;  %v215_v55 = vld [vmem:[#allocation10 + $0x98] sm:$0xff]  ;;  %v212_v16 = vld [vmem:[#allocation10 + $0x80] sm:$0xff]  ;;  %v435_v23 = vadd.f32 %v434_v29, %v214_v54 }
 0x246   :  { %v1513_v32 = vadd.f32 %v450_v50, %v1324_v2  ;;  %v503_v2 = vadd.f32 %v502_v22, %v217_v35  ;;  %v500_v22 = vadd.f32 %v499_v28, %v215_v55  ;;  %v432_v29 = vadd.f32 %v1502_v58, %v212_v16  ;;  %v208_v50 = vld [vmem:[#allocation10 + $0x60] sm:$0xff]  ;;  %v205_v55 = vld [vmem:[#allocation10 + $0x48] sm:$0xff]  ;;  %v1970_v16 = vld [vmem:[#allocation22_spill] sm:$0xff] }
 0x247   :  { %v1516_v33 = vadd.f32 %v515_v51, %v1328_v3  ;;  %v497_v28 = vadd.f32 %v1504_v59, %v213_v24  ;;  %v209_v51 = vld [vmem:[#allocation10 + $0x68] sm:$0xff]  ;;  %v1559_v11 = vadd.f32 %v438_v17, %v1962_v49  ;;  %v429_v58 = vadd.f32 %v1498_v27, %v210_v57  ;;  %v204_v54 = vld [vmem:[#allocation10 + $0x40] sm:$0xff]  ;;  %v202_v57 = vld [vmem:[#allocation10 + $0x30] sm:$0xff] }
 0x248   :  { %1952 = vst [vmem:[#allocation42_spill] sm:$0xff] %v1513_v32  ;;  %v1873_v3 = vmax.f32 %v1513_v32, 0.0  ;;  %v494_v59 = vadd.f32 %v1500_v26, %v211_v52  ;;  %v1573_v35 = vadd.f32 %v435_v23, %v1966_v34  ;;  %v426_v27 = vadd.f32 %v1494_v44, %v208_v50  ;;  %v1972_v23 = vld [vmem:[#allocation23_spill] sm:$0xff]  ;;  %v200_v49 = vld [vmem:[#allocation10 + $0x20] sm:$0xff] }
 0x249   :  { %1953 = vst [vmem:[#allocation43_spill] sm:$0xff] %v1516_v33  ;;  %v1872_v56 = vmax.f32 %v1516_v33, 0.0  ;;  %v491_v26 = vadd.f32 %v1496_v45, %v209_v51  ;;  %v1881_v17 = vmax.f32 %v1559_v11, 0.0  ;;  %v1587_v24 = vadd.f32 %v432_v29, %v1970_v16  ;;  %v203_v52 = vld [vmem:[#allocation10 + $0x38] sm:$0xff]  ;;  %v1974_v29 = vld [vmem:[#allocation24_spill] sm:$0xff]  ;;  %v628_v33 = vld [vmem:[#allocation7 + $0x1d0] sm:$0xff] }
 0x24a   :  { %1963 = vst [vmem:[#allocation18_spill] sm:$0xff] %v1559_v11  ;;  %v1601_v50 = vadd.f32 %v429_v58, %v1974_v29  ;;  %v629_v32 = vld [vmem:[#allocation7 + $0x1d8] sm:$0xff]  ;;  %v627_v11 = vld [vmem:[#allocation7 + $0x1c8] sm:$0xff] }
 0x24b   :  { %v452_v10 = vpop.f32.mrf.mxu2  ;;  %1967 = vst [vmem:[#allocation20_spill] sm:$0xff] %v1573_v35 }
 0x24c   :  { %v517_v48 = vpop.f32.mrf.mxu3  ;;  %v453_v12 = vadd.f32 %v452_v10, %v226_v53  ;;  %1971 = vst [vmem:[#allocation22_spill] sm:$0xff] %v1587_v24  ;;  %v1887_v16 = vmax.f32 %v1601_v50, 0.0 }
 0x24d   :  { %v518_v13 = vadd.f32 %v517_v48, %v227_v25  ;;  %1975 = vst [vmem:[#allocation24_spill] sm:$0xff] %v1601_v50  ;;  %v625_v50 = vld [vmem:[#allocation7 + $0x1b8] sm:$0xff] }
 0x24e   :  { %v1507_v36 = vadd.f32 %v453_v12, %v1320_v0  ;;  %v1521_v0 = vadd.f32 %v447_v9, %v1330_v4  ;;  %v1533_v4 = vadd.f32 %v444_v18, %v1336_v6  ;;  %v1545_v6 = vadd.f32 %v441_v20, %v1958_v14  ;;  %v1964_v9 = vld [vmem:[#allocation19_spill] sm:$0xff]  ;;  %v206_v12 = vld [vmem:[#allocation10 + $0x50] sm:$0xff]  ;;  %v1968_v20 = vld [vmem:[#allocation21_spill] sm:$0xff] }
 0x24f   :  { %v1510_v37 = vadd.f32 %v518_v13, %v1322_v1  ;;  %v1524_v1 = vadd.f32 %v512_v8, %v1332_v5  ;;  %v1536_v5 = vadd.f32 %v509_v19, %v1338_v7  ;;  %v1548_v7 = vadd.f32 %v506_v21, %v1960_v15  ;;  %v207_v13 = vld [vmem:[#allocation10 + $0x58] sm:$0xff] }
 0x250   :  { %1950 = vst [vmem:[#allocation40_spill] sm:$0xff] %v1507_v36  ;;  %v1871_v30 = vmax.f32 %v1507_v36, 0.0  ;;  %v1875_v53 = vmax.f32 %v1521_v0, 0.0  ;;  %v1877_v10 = vmax.f32 %v1533_v4, 0.0  ;;  %v1562_v8 = vadd.f32 %v503_v2, %v1964_v9  ;;  %v201_v9 = vld [vmem:[#allocation10 + $0x28] sm:$0xff]  ;;  %v633_v36 = vld [vmem:[#allocation7 + $0x1f8] sm:$0xff] }
 0x251   :  { %1951 = vst [vmem:[#allocation41_spill] sm:$0xff] %v1510_v37  ;;  %v1870_v31 = vmax.f32 %v1510_v37, 0.0  ;;  %v1874_v25 = vmax.f32 %v1524_v1, 0.0  ;;  %v1876_v48 = vmax.f32 %v1536_v5, 0.0  ;;  %v1879_v18 = vmax.f32 %v1545_v6, 0.0  ;;  %v632_v37 = vld [vmem:[#allocation7 + $0x1f0] sm:$0xff] }
 0x252   :  { %1954 = vst [vmem:[#allocation44_spill] sm:$0xff] %v1521_v0  ;;  %684 = vmatpush.msrb.mxu0 %v1871_v30  ;;  %v1878_v19 = vmax.f32 %v1548_v7, 0.0  ;;  %v1576_v21 = vadd.f32 %v500_v22, %v1968_v20  ;;  %v1880_v2 = vmax.f32 %v1562_v8, 0.0  ;;  %v1590_v22 = vadd.f32 %v497_v28, %v1972_v23  ;;  %v1976_v28 = vld [vmem:[#allocation25_spill] sm:$0xff]  ;;  %v1982_v23 = vld [vmem:[#allocation28_spill] sm:$0xff] }
 0x253   :  { %1955 = vst [vmem:[#allocation45_spill] sm:$0xff] %v1524_v1  ;;  %749 = vmatpush.msrb.mxu1 %v1870_v31  ;;  %v423_v44 = vadd.f32 %v1490_v60, %v206_v12  ;;  %v488_v45 = vadd.f32 %v1492_v61, %v207_v13  ;;  %v1883_v14 = vmax.f32 %v1573_v35, 0.0  ;;  %v1604_v51 = vadd.f32 %v494_v59, %v1976_v28  ;;  %v1978_v13 = vld [vmem:[#allocation26_spill] sm:$0xff]  ;;  %v1980_v59 = vld [vmem:[#allocation27_spill] sm:$0xff]  ;;  %v1990_v31 = vld [vmem:[#allocation32_spill] sm:$0xff] }
 0x254   :  { %1956 = vst [vmem:[#allocation46_spill] sm:$0xff] %v1533_v4  ;;  %685 = vmatpush.msrb.mxu0 %v1873_v3  ;;  %v1882_v15 = vmax.f32 %v1576_v21, 0.0  ;;  %v420_v60 = vadd.f32 %v1486_v46, %v204_v54  ;;  %v485_v61 = vadd.f32 %v1488_v47, %v205_v55  ;;  %v1885_v12 = vmax.f32 %v1587_v24, 0.0  ;;  %v198_v54 = vld [vmem:[#allocation10 + $0x10] sm:$0xff]  ;;  %v199_v55 = vld [vmem:[#allocation10 + $0x18] sm:$0xff] }
 0x255   :  { %1957 = vst [vmem:[#allocation47_spill] sm:$0xff] %v1536_v5  ;;  %750 = vmatpush.msrb.mxu1 %v1872_v56  ;;  %v1884_v58 = vmax.f32 %v1590_v22, 0.0  ;;  %v1615_v34 = vadd.f32 %v426_v27, %v1978_v13  ;;  %v1618_v20 = vadd.f32 %v491_v26, %v1980_v59  ;;  %v417_v46 = vadd.f32 %v1482_v42, %v202_v57  ;;  %v1984_v26 = vld [vmem:[#allocation29_spill] sm:$0xff]  ;;  %v196_v57 = vld [vmem:[#allocation10] sm:$0xff]  ;;  %v1986_v59 = vld [vmem:[#allocation30_spill] sm:$0xff] }
 0x256   :  { %1959 = vst [vmem:[#allocation16_spill] sm:$0xff] %v1545_v6  ;;  %686 = vmatpush.msrb.mxu0 %v1875_v53  ;;  %v482_v47 = vadd.f32 %v1484_v43, %v203_v52  ;;  %v1886_v27 = vmax.f32 %v1604_v51, 0.0  ;;  %v1629_v29 = vadd.f32 %v423_v44, %v1982_v23  ;;  %v1632_v28 = vadd.f32 %v488_v45, %v1984_v26  ;;  %v197_v52 = vld [vmem:[#allocation10 + $0x8] sm:$0xff]  ;;  %v1988_v45 = vld [vmem:[#allocation31_spill] sm:$0xff] }
 0x257   :  { %1961 = vst [vmem:[#allocation17_spill] sm:$0xff] %v1548_v7  ;;  %751 = vmatpush.msrb.mxu1 %v1874_v25  ;;  %v414_v42 = vadd.f32 %v1478_v62, %v200_v49  ;;  %v479_v43 = vadd.f32 %v1480_v63, %v201_v9  ;;  %v1889_v13 = vmax.f32 %v1615_v34, 0.0  ;;  %v1888_v44 = vmax.f32 %v1618_v20, 0.0  ;;  %v1997_v56 = vld [vmem:[#allocation39_spill] sm:$0xff]  ;;  %v589_v25 = vld [vmem:[#allocation5 + $0xa0] sm:$0xff]  ;;  %v590_v53 = vld [vmem:[#allocation5 + $0xa8] sm:$0xff] }
 0x258   :  { %1965 = vst [vmem:[#allocation19_spill] sm:$0xff] %v1562_v8  ;;  %687 = vmatpush.msrb.mxu0 %v1877_v10  ;;  %v1643_v23 = vadd.f32 %v420_v60, %v1986_v59  ;;  %v1646_v26 = vadd.f32 %v485_v61, %v1988_v45  ;;  %v411_v62 = vadd.f32 %v1474_v40, %v198_v54  ;;  %v1891_v49 = vmax.f32 %v1629_v29, 0.0  ;;  %v1991_v59 = vld [vmem:[#allocation33_spill] sm:$0xff]  ;;  %v1992_v45 = vld [vmem:[#allocation34_spill] sm:$0xff]  ;;  %v592_v10 = vld [vmem:[#allocation5 + $0xb8] sm:$0xff] }
 0x259   :  { %752 = vmatpush.msrb.mxu1 %v1876_v48  ;;  %1969 = vst [vmem:[#allocation21_spill] sm:$0xff] %v1576_v21  ;;  %v476_v63 = vadd.f32 %v1476_v41, %v199_v55  ;;  %v1890_v9 = vmax.f32 %v1632_v28, 0.0  ;;  %v1657_v60 = vadd.f32 %v417_v46, %v1990_v31  ;;  %v1660_v61 = vadd.f32 %v482_v47, %v1991_v59  ;;  %v1993_v46 = vld [vmem:[#allocation35_spill] sm:$0xff]  ;;  %v1995_v59 = vld [vmem:[#allocation37_spill] sm:$0xff]  ;;  %v591_v48 = vld [vmem:[#allocation5 + $0xb0] sm:$0xff] }
 0x25a   :  { %688 = vmatpush.msrb.mxu0 %v1879_v18  ;;  %1973 = vst [vmem:[#allocation23_spill] sm:$0xff] %v1590_v22  ;;  %v408_v40 = vadd.f32 %v1470_v38, %v196_v57  ;;  %v473_v41 = vadd.f32 %v1472_v39, %v197_v52  ;;  %v1893_v54 = vmax.f32 %v1643_v23, 0.0  ;;  %v1892_v55 = vmax.f32 %v1646_v26, 0.0  ;;  %v1994_v57 = vld [vmem:[#allocation36_spill] sm:$0xff] }
 0x25b   :  { %753 = vmatpush.msrb.mxu1 %v1878_v19  ;;  %1977 = vst [vmem:[#allocation25_spill] sm:$0xff] %v1604_v51  ;;  %v1671_v31 = vadd.f32 %v414_v42, %v1992_v45  ;;  %v1674_v47 = vadd.f32 %v479_v43, %v1993_v46  ;;  %v1895_v38 = vmax.f32 %v1657_v60, 0.0  ;;  %v1894_v39 = vmax.f32 %v1660_v61, 0.0  ;;  %v1996_v45 = vld [vmem:[#allocation38_spill] sm:$0xff]  ;;  %v626_v8 = vld [vmem:[#allocation7 + $0x1c0] sm:$0xff] }
 0x25c   :  { %689 = vmatpush.msrb.mxu0 %v1881_v17  ;;  %1979 = vst [vmem:[#allocation26_spill] sm:$0xff] %v1615_v34  ;;  %v1683_v52 = vadd.f32 %v411_v62, %v1994_v57  ;;  %v1686_v30 = vadd.f32 %v476_v63, %v1995_v59  ;;  %v1695_v46 = vadd.f32 %v408_v40, %v1996_v45  ;;  %v586_v57 = vld [vmem:[#allocation5 + $0x88] sm:$0xff]  ;;  %v587_v59 = vld [vmem:[#allocation5 + $0x90] sm:$0xff]  ;;  %v588_v45 = vld [vmem:[#allocation5 + $0x98] sm:$0xff] }
 0x25d   :  { %754 = vmatpush.msrb.mxu1 %v1880_v2  ;;  %1981 = vst [vmem:[#allocation27_spill] sm:$0xff] %v1618_v20  ;;  %v1897_v42 = vmax.f32 %v1671_v31, 0.0  ;;  %v1896_v43 = vmax.f32 %v1674_v47, 0.0  ;;  %v1698_v3 = vadd.f32 %v473_v41, %v1997_v56  ;;  %v585_v41 = vld [vmem:[#allocation5 + $0x80] sm:$0xff]  ;;  %v624_v51 = vld [vmem:[#allocation7 + $0x1b0] sm:$0xff] }
 0x25e   :  { %690 = vmatpush.msrb.mxu0 %v1883_v14  ;;  %1983 = vst [vmem:[#allocation28_spill] sm:$0xff] %v1629_v29  ;;  %v1899_v62 = vmax.f32 %v1683_v52, 0.0  ;;  %v1898_v63 = vmax.f32 %v1686_v30, 0.0  ;;  %v1901_v40 = vmax.f32 %v1695_v46, 0.0 }
 0x25f   :  { %755 = vmatpush.msrb.mxu1 %v1882_v15  ;;  %1985 = vst [vmem:[#allocation29_spill] sm:$0xff] %v1632_v28  ;;  %v1900_v56 = vmax.f32 %v1698_v3, 0.0 }
 0x260   :  { %691 = vmatpush.msrb.mxu0 %v1885_v12  ;;  %1987 = vst [vmem:[#allocation30_spill] sm:$0xff] %v1643_v23  ;;  %v623_v23 = vld [vmem:[#allocation7 + $0x1a8] sm:$0xff] }
 0x261   :  { %756 = vmatpush.msrb.mxu1 %v1884_v58  ;;  %1989 = vst [vmem:[#allocation31_spill] sm:$0xff] %v1646_v26  ;;  %v622_v26 = vld [vmem:[#allocation7 + $0x1a0] sm:$0xff] }
 0x262   :  { %692 = vmatpush.msrb.mxu0 %v1887_v16 }
 0x263   :  { %757 = vmatpush.msrb.mxu1 %v1886_v27 }
 0x264   :  { %693 = vmatpush.msrb.mxu0 %v1889_v13 }
 0x265   :  { %758 = vmatpush.msrb.mxu1 %v1888_v44 }
 0x266   :  { %694 = vmatpush.msrb.mxu0 %v1891_v49 }
 0x267   :  { %759 = vmatpush.msrb.mxu1 %v1890_v9 }
 0x268   :  { %695 = vmatpush.msrb.mxu0 %v1893_v54 }
 0x269   :  { %760 = vmatpush.msrb.mxu1 %v1892_v55 }
 0x26a   :  { %696 = vmatpush.msrb.mxu0 %v1895_v38 }
 0x26b   :  { %761 = vmatpush.msrb.mxu1 %v1894_v39 }
 0x26c   :  { %697 = vmatpush.msrb.mxu0 %v1897_v42 }
 0x26d   :  { %762 = vmatpush.msrb.mxu1 %v1896_v43 }
 0x26e   :  { %698 = vmatpush.msrb.mxu0 %v1899_v62 }
 0x26f   :  { %763 = vmatpush.msrb.mxu1 %v1898_v63 }
 0x270   :  { %699 = vmatpush.msrb.mxu0 %v1901_v40  ;;  %v631_v40 = vld [vmem:[#allocation7 + $0x1e8] sm:$0xff] }
 0x271   :  { %764 = vmatpush.msrb.mxu1 %v1900_v56  ;;  %700 = vmatmul.f32.vlgmr.msrb.gmra.mxu0 %v585_v41  ;;  %v630_v56 = vld [vmem:[#allocation7 + $0x1e0] sm:$0xff] }
 0x272   :  { %765 = vmatmul.f32.vlgmr.msrb.gmra.mxu1 %v585_v41  ;;  %v593_v41 = vld [vmem:[#allocation5 + $0xc0] sm:$0xff] }
 0x279   :  { %703 = vmatmul.f32.gmra.mxu0 %v586_v57 }
 0x27a   :  { %768 = vmatmul.f32.gmra.mxu1 %v586_v57  ;;  %v594_v57 = vld [vmem:[#allocation5 + $0xc8] sm:$0xff] }
 0x281   :  { %706 = vmatmul.f32.gmra.mxu0 %v587_v59 }
 0x282   :  { %771 = vmatmul.f32.gmra.mxu1 %v587_v59  ;;  %v595_v59 = vld [vmem:[#allocation5 + $0xd0] sm:$0xff] }
 0x289   :  { %709 = vmatmul.f32.gmra.mxu0 %v588_v45 }
 0x28a   :  { %774 = vmatmul.f32.gmra.mxu1 %v588_v45  ;;  %v596_v45 = vld [vmem:[#allocation5 + $0xd8] sm:$0xff] }
 0x291   :  { %712 = vmatmul.f32.gmra.mxu0 %v589_v25 }
 0x292   :  { %777 = vmatmul.f32.gmra.mxu1 %v589_v25  ;;  %v597_v25 = vld [vmem:[#allocation5 + $0xe0] sm:$0xff] }
 0x299   :  { %715 = vmatmul.f32.gmra.mxu0 %v590_v53 }
 0x29a   :  { %780 = vmatmul.f32.gmra.mxu1 %v590_v53  ;;  %v598_v53 = vld [vmem:[#allocation5 + $0xe8] sm:$0xff] }
 0x2a1   :  { %718 = vmatmul.f32.gmra.mxu0 %v591_v48 }
 0x2a2   :  { %783 = vmatmul.f32.gmra.mxu1 %v591_v48  ;;  %v599_v48 = vld [vmem:[#allocation5 + $0xf0] sm:$0xff] }
 0x2a9   :  { %721 = vmatmul.f32.gmra.mxu0 %v592_v10 }
 0x2aa   :  { %786 = vmatmul.f32.gmra.mxu1 %v592_v10  ;;  %v600_v10 = vld [vmem:[#allocation5 + $0xf8] sm:$0xff] }
 0x2b1   :  { %724 = vmatmul.f32.gmra.mxu0 %v593_v41 }
 0x2b2   :  { %789 = vmatmul.f32.gmra.mxu1 %v593_v41 }
 0x2b9   :  { %727 = vmatmul.f32.gmra.mxu0 %v594_v57 }
 0x2ba   :  { %792 = vmatmul.f32.gmra.mxu1 %v594_v57 }
 0x2c1   :  { %730 = vmatmul.f32.gmra.mxu0 %v595_v59 }
 0x2c2   :  { %795 = vmatmul.f32.gmra.mxu1 %v595_v59 }
 0x2c9   :  { %733 = vmatmul.f32.gmra.mxu0 %v596_v45 }
 0x2ca   :  { %798 = vmatmul.f32.gmra.mxu1 %v596_v45 }
 0x2d1   :  { %736 = vmatmul.f32.gmra.mxu0 %v597_v25 }
 0x2d2   :  { %801 = vmatmul.f32.gmra.mxu1 %v597_v25 }
 0x2d9   :  { %739 = vmatmul.f32.gmra.mxu0 %v598_v53 }
 0x2da   :  { %804 = vmatmul.f32.gmra.mxu1 %v598_v53 }
 0x2e1   :  { %742 = vmatmul.f32.gmra.mxu0 %v599_v48 }
 0x2e2   :  { %807 = vmatmul.f32.gmra.mxu1 %v599_v48 }
 0x2e9   :  { %745 = vmatmul.f32.gmra.mxu0 %v600_v10 }
 0x2ea   :  { %810 = vmatmul.f32.gmra.mxu1 %v600_v10 }
 0x2ee   :  { %v1716_v41 = vpop.f32.mrf.mxu0 }
 0x2ef   :  { %v1718_v57 = vpop.f32.mrf.mxu1 }
 0x2f6   :  { %v1720_v59 = vpop.f32.mrf.mxu0 }
 0x2f7   :  { %v1722_v19 = vpop.f32.mrf.mxu1 }
 0x2fe   :  { %v1724_v45 = vpop.f32.mrf.mxu0 }
 0x2ff   :  { %v1726_v25 = vpop.f32.mrf.mxu1 }
 0x306   :  { %v1728_v18 = vpop.f32.mrf.mxu0 }
 0x307   :  { %v1730_v53 = vpop.f32.mrf.mxu1 }
 0x30e   :  { %v1732_v48 = vpop.f32.mrf.mxu0 }
 0x30f   :  { %v1734_v2 = vpop.f32.mrf.mxu1 }
 0x316   :  { %v1736_v10 = vpop.f32.mrf.mxu0 }
 0x317   :  { %v1738_v17 = vpop.f32.mrf.mxu1 }
 0x31e   :  { %v1740_v15 = vpop.f32.mrf.mxu0 }
 0x31f   :  { %v1742_v14 = vpop.f32.mrf.mxu1 }
 0x326   :  { %v1744_v58 = vpop.f32.mrf.mxu0 }
 0x327   :  { %v1746_v12 = vpop.f32.mrf.mxu1 }
 0x32e   :  { %v1748_v27 = vpop.f32.mrf.mxu0 }
 0x32f   :  { %v1750_v16 = vpop.f32.mrf.mxu1 }
 0x336   :  { %v728_v44 = vpop.f32.mrf.mxu0 }
 0x337   :  { %v793_v13 = vpop.f32.mrf.mxu1 }
 0x33e   :  { %v731_v9 = vpop.f32.mrf.mxu0 }
 0x33f   :  { %v796_v49 = vpop.f32.mrf.mxu1 }
 0x346   :  { %v734_v55 = vpop.f32.mrf.mxu0 }
 0x347   :  { %v799_v54 = vpop.f32.mrf.mxu1 }
 0x34e   :  { %v737_v39 = vpop.f32.mrf.mxu0 }
 0x34f   :  { %v802_v38 = vpop.f32.mrf.mxu1  ;;  %v738_v20 = vadd.f32 %v737_v39, %v626_v8  ;;  %v611_v39 = vld [vmem:[#allocation7 + $0x148] sm:$0xff] }
 0x350   :  { %v803_v34 = vadd.f32 %v802_v38, %v627_v11  ;;  %v610_v38 = vld [vmem:[#allocation7 + $0x140] sm:$0xff] }
 0x356   :  { %v740_v43 = vpop.f32.mrf.mxu0 }
 0x357   :  { %v805_v42 = vpop.f32.mrf.mxu1  ;;  %v741_v21 = vadd.f32 %v740_v43, %v628_v33  ;;  %v620_v33 = vld [vmem:[#allocation7 + $0x190] sm:$0xff] }
 0x358   :  { %v806_v35 = vadd.f32 %v805_v42, %v629_v32  ;;  %v621_v32 = vld [vmem:[#allocation7 + $0x198] sm:$0xff]  ;;  %v729_v11 = vadd.f32 %v728_v44, %v620_v33 }
 0x359   :  { %v794_v8 = vadd.f32 %v793_v13, %v621_v32 }
 0x35a   :  { %v832_v44 = vmax.f32 %v729_v11, 0.0 }
 0x35e   :  { %v743_v63 = vpop.f32.mrf.mxu0 }
 0x35f   :  { %v808_v62 = vpop.f32.mrf.mxu1  ;;  %v744_v5 = vadd.f32 %v743_v63, %v630_v56  ;;  %v735_v63 = vadd.f32 %v734_v55, %v624_v51  ;;  %v609_v56 = vld [vmem:[#allocation7 + $0x138] sm:$0xff] }
 0x360   :  { %v809_v4 = vadd.f32 %v808_v62, %v631_v40  ;;  %v800_v62 = vadd.f32 %v799_v54, %v625_v50  ;;  %v608_v40 = vld [vmem:[#allocation7 + $0x130] sm:$0xff] }
 0x361   :  { %v842_v28 = vmax.f32 %v744_v5, 0.0  ;;  %v618_v5 = vld [vmem:[#allocation7 + $0x180] sm:$0xff] }
 0x362   :  { %v843_v29 = vmax.f32 %v809_v4, 0.0  ;;  %v619_v4 = vld [vmem:[#allocation7 + $0x188] sm:$0xff]  ;;  %v726_v50 = vadd.f32 %v1748_v27, %v618_v5  ;;  %v602_v5 = vld [vmem:[#allocation7 + $0x100] sm:$0xff] }
 0x363   :  { %v791_v51 = vadd.f32 %v1750_v16, %v619_v4  ;;  %v603_v4 = vld [vmem:[#allocation7 + $0x108] sm:$0xff] }
 0x364   :  { %v830_v54 = vmax.f32 %v726_v50, 0.0 }
 0x365   :  { %v831_v55 = vmax.f32 %v791_v51, 0.0  ;;  %v638_v51 = vld [vmem:[#allocation8 + $0x98] sm:$0xff] }
 0x366   :  { %v746_v1 = vpop.f32.mrf.mxu0 }
 0x367   :  { %v811_v0 = vpop.f32.mrf.mxu1  ;;  %v747_v7 = vadd.f32 %v746_v1, %v632_v37  ;;  %v840_v37 = vmax.f32 %v741_v21, 0.0  ;;  %v797_v1 = vadd.f32 %v796_v49, %v623_v23  ;;  %v616_v21 = vld [vmem:[#allocation7 + $0x170] sm:$0xff] }
 0x368   :  { %v812_v6 = vadd.f32 %v811_v0, %v633_v36  ;;  %v841_v36 = vmax.f32 %v806_v35, 0.0  ;;  %v732_v0 = vadd.f32 %v731_v9, %v622_v26  ;;  %v617_v35 = vld [vmem:[#allocation7 + $0x178] sm:$0xff]  ;;  %v723_v23 = vadd.f32 %v1744_v58, %v616_v21  ;;  %v612_v49 = vld [vmem:[#allocation7 + $0x150] sm:$0xff] }
 0x369   :  { %v844_v22 = vmax.f32 %v747_v7, 0.0  ;;  %v839_v7 = vmax.f32 %v803_v34, 0.0  ;;  %v614_v34 = vld [vmem:[#allocation7 + $0x160] sm:$0xff]  ;;  %v788_v13 = vadd.f32 %v1746_v12, %v617_v35  ;;  %v833_v26 = vmax.f32 %v794_v8, 0.0  ;;  %v613_v9 = vld [vmem:[#allocation7 + $0x158] sm:$0xff] }
 0x36a   :  { %v845_v24 = vmax.f32 %v812_v6, 0.0  ;;  %v838_v6 = vmax.f32 %v738_v20, 0.0  ;;  %v615_v20 = vld [vmem:[#allocation7 + $0x168] sm:$0xff]  ;;  %v720_v27 = vadd.f32 %v1740_v15, %v614_v34  ;;  %v717_v58 = vadd.f32 %v1736_v10, %v612_v49  ;;  %v641_v34 = vld [vmem:[#allocation8 + $0xb0] sm:$0xff]  ;;  %v647_v49 = vld [vmem:[#allocation8 + $0xe0] sm:$0xff] }
 0x36b   :  { %846 = vmatpush.msrb.mxu2 %v844_v22  ;;  %v837_v22 = vmax.f32 %v800_v62, 0.0  ;;  %v785_v16 = vadd.f32 %v1742_v14, %v615_v20  ;;  %v782_v12 = vadd.f32 %v1738_v17, %v613_v9  ;;  %v828_v42 = vmax.f32 %v723_v23, 0.0  ;;  %v642_v20 = vld [vmem:[#allocation8 + $0xb8] sm:$0xff]  ;;  %v643_v23 = vld [vmem:[#allocation8 + $0xc0] sm:$0xff]  ;;  %v648_v9 = vld [vmem:[#allocation8 + $0xe8] sm:$0xff] }
 0x36c   :  { %911 = vmatpush.msrb.mxu3 %v845_v24  ;;  %v836_v24 = vmax.f32 %v735_v63, 0.0  ;;  %v829_v43 = vmax.f32 %v788_v13, 0.0  ;;  %v714_v15 = vadd.f32 %v1732_v48, %v610_v38  ;;  %v779_v14 = vadd.f32 %v1734_v2, %v611_v39  ;;  %v644_v13 = vld [vmem:[#allocation8 + $0xc8] sm:$0xff] }
 0x36d   :  { %847 = vmatpush.msrb.mxu2 %v842_v28  ;;  %v835_v28 = vmax.f32 %v797_v1, 0.0  ;;  %v826_v63 = vmax.f32 %v720_v27, 0.0  ;;  %v827_v62 = vmax.f32 %v785_v16, 0.0  ;;  %v711_v10 = vadd.f32 %v1728_v18, %v608_v40  ;;  %v605_v1 = vld [vmem:[#allocation7 + $0x118] sm:$0xff]  ;;  %v649_v27 = vld [vmem:[#allocation8 + $0xf0] sm:$0xff] }
 0x36e   :  { %912 = vmatpush.msrb.mxu3 %v843_v29  ;;  %v834_v29 = vmax.f32 %v732_v0, 0.0  ;;  %v776_v17 = vadd.f32 %v1730_v53, %v609_v56  ;;  %v824_v33 = vmax.f32 %v717_v58, 0.0  ;;  %v825_v32 = vmax.f32 %v782_v12, 0.0  ;;  %v604_v0 = vld [vmem:[#allocation7 + $0x110] sm:$0xff]  ;;  %v650_v16 = vld [vmem:[#allocation8 + $0xf8] sm:$0xff] }
 0x36f   :  { %848 = vmatpush.msrb.mxu2 %v840_v37  ;;  %v606_v37 = vld [vmem:[#allocation7 + $0x120] sm:$0xff]  ;;  %v705_v18 = vadd.f32 %v1720_v59, %v604_v0  ;;  %v770_v53 = vadd.f32 %v1722_v19, %v605_v1  ;;  %v820_v11 = vmax.f32 %v711_v10, 0.0  ;;  %v1999_v40 = vmax.f32 %v1698_v3, 0.0 }
 0x370   :  { %913 = vmatpush.msrb.mxu3 %v841_v36  ;;  %v607_v36 = vld [vmem:[#allocation7 + $0x128] sm:$0xff]  ;;  %v708_v48 = vadd.f32 %v1724_v45, %v606_v37  ;;  %v821_v8 = vmax.f32 %v776_v17, 0.0  ;;  %v767_v45 = vadd.f32 %v1718_v57, %v603_v4  ;;  %v635_v19 = vld [vmem:[#allocation8 + $0x80] sm:$0xff]  ;;  %v637_v57 = vld [vmem:[#allocation8 + $0x90] sm:$0xff]  ;;  %v2001_v0 = vmax.f32 %v1686_v30, 0.0 }
 0x371   :  { %849 = vmatpush.msrb.mxu2 %v838_v6  ;;  %v773_v2 = vadd.f32 %v1726_v25, %v607_v36  ;;  %v822_v6 = vmax.f32 %v714_v15, 0.0  ;;  %v816_v21 = vmax.f32 %v705_v18, 0.0  ;;  %v817_v35 = vmax.f32 %v770_v53, 0.0  ;;  %v656_v3 = vld [vmem:[#allocation10 + $0x120] sm:$0xff]  ;;  %v658_v30 = vld [vmem:[#allocation10 + $0x130] sm:$0xff] }
 0x372   :  { %914 = vmatpush.msrb.mxu3 %v839_v7  ;;  %v823_v7 = vmax.f32 %v779_v14, 0.0  ;;  %v815_v59 = vmax.f32 %v767_v45, 0.0  ;;  %v2002_v18 = vmax.f32 %v1671_v31, 0.0  ;;  %v659_v45 = vld [vmem:[#allocation10 + $0x138] sm:$0xff] }
 0x373   :  { %850 = vmatpush.msrb.mxu2 %v836_v24  ;;  %v702_v24 = vadd.f32 %v1716_v41, %v602_v5  ;;  %v819_v25 = vmax.f32 %v773_v2, 0.0  ;;  %v636_v41 = vld [vmem:[#allocation8 + $0x88] sm:$0xff] }
 0x374   :  { %915 = vmatpush.msrb.mxu3 %v837_v22  ;;  %v818_v22 = vmax.f32 %v708_v48, 0.0  ;;  %v657_v2 = vld [vmem:[#allocation10 + $0x128] sm:$0xff] }
 0x375   :  { %851 = vmatpush.msrb.mxu2 %v834_v29  ;;  %v814_v50 = vmax.f32 %v702_v24, 0.0  ;;  %v639_v29 = vld [vmem:[#allocation8 + $0xa0] sm:$0xff] }
 0x376   :  { %916 = vmatpush.msrb.mxu3 %v835_v28  ;;  %v640_v28 = vld [vmem:[#allocation8 + $0xa8] sm:$0xff] }
 0x377   :  { %852 = vmatpush.msrb.mxu2 %v832_v44  ;;  %v645_v44 = vld [vmem:[#allocation8 + $0xd0] sm:$0xff] }
 0x378   :  { %917 = vmatpush.msrb.mxu3 %v833_v26  ;;  %v646_v26 = vld [vmem:[#allocation8 + $0xd8] sm:$0xff] }
 0x379   :  { %853 = vmatpush.msrb.mxu2 %v830_v54  ;;  %v652_v54 = vld [vmem:[#allocation10 + $0x100] sm:$0xff] }
 0x37a   :  { %918 = vmatpush.msrb.mxu3 %v831_v55  ;;  %v653_v55 = vld [vmem:[#allocation10 + $0x108] sm:$0xff] }
 0x37b   :  { %854 = vmatpush.msrb.mxu2 %v828_v42  ;;  %v1998_v42 = vmax.f32 %v1695_v46, 0.0 }
 0x37c   :  { %919 = vmatpush.msrb.mxu3 %v829_v43 }
 0x37d   :  { %855 = vmatpush.msrb.mxu2 %v826_v63  ;;  %v654_v63 = vld [vmem:[#allocation10 + $0x110] sm:$0xff] }
 0x37e   :  { %920 = vmatpush.msrb.mxu3 %v827_v62  ;;  %v655_v62 = vld [vmem:[#allocation10 + $0x118] sm:$0xff] }
 0x37f   :  { %856 = vmatpush.msrb.mxu2 %v824_v33  ;;  %v2000_v33 = vmax.f32 %v1683_v52, 0.0 }
 0x380   :  { %921 = vmatpush.msrb.mxu3 %v825_v32 }
 0x381   :  { %857 = vmatpush.msrb.mxu2 %v822_v6 }
 0x382   :  { %922 = vmatpush.msrb.mxu3 %v823_v7 }
 0x383   :  { %858 = vmatpush.msrb.mxu2 %v820_v11  ;;  %v2003_v11 = vmax.f32 %v1674_v47, 0.0  ;;  %v660_v47 = vld [vmem:[#allocation10 + $0x140] sm:$0xff] }
 0x384   :  { %923 = vmatpush.msrb.mxu3 %v821_v8 }
 0x385   :  { %859 = vmatpush.msrb.mxu2 %v818_v22 }
 0x386   :  { %924 = vmatpush.msrb.mxu3 %v819_v25 }
 0x387   :  { %860 = vmatpush.msrb.mxu2 %v816_v21 }
 0x388   :  { %925 = vmatpush.msrb.mxu3 %v817_v35 }
 0x389   :  { %861 = vmatpush.msrb.mxu2 %v814_v50  ;;  %v2004_v50 = vmax.f32 %v1657_v60, 0.0 }
 0x38a   :  { %926 = vmatpush.msrb.mxu3 %v815_v59  ;;  %862 = vmatmul.f32.vlgmr.msrb.gmra.mxu2 %v635_v19 }
 0x38b   :  { %927 = vmatmul.f32.vlgmr.msrb.gmra.mxu3 %v635_v19  ;;  %v2005_v19 = vmax.f32 %v1660_v61, 0.0  ;;  %v662_v61 = vld [vmem:[#allocation10 + $0x150] sm:$0xff] }
 0x392   :  { %865 = vmatmul.f32.gmra.mxu2 %v636_v41 }
 0x393   :  { %930 = vmatmul.f32.gmra.mxu3 %v636_v41 }
 0x39a   :  { %868 = vmatmul.f32.gmra.mxu2 %v637_v57 }
 0x39b   :  { %933 = vmatmul.f32.gmra.mxu3 %v637_v57 }
 0x3a2   :  { %871 = vmatmul.f32.gmra.mxu2 %v638_v51 }
 0x3a3   :  { %936 = vmatmul.f32.gmra.mxu3 %v638_v51  ;;  %v661_v51 = vld [vmem:[#allocation10 + $0x148] sm:$0xff] }
 0x3aa   :  { %874 = vmatmul.f32.gmra.mxu2 %v639_v29 }
 0x3ab   :  { %939 = vmatmul.f32.gmra.mxu3 %v639_v29 }
 0x3b2   :  { %877 = vmatmul.f32.gmra.mxu2 %v640_v28 }
 0x3b3   :  { %942 = vmatmul.f32.gmra.mxu3 %v640_v28 }
 0x3ba   :  { %880 = vmatmul.f32.gmra.mxu2 %v641_v34 }
 0x3bb   :  { %945 = vmatmul.f32.gmra.mxu3 %v641_v34 }
 0x3c2   :  { %883 = vmatmul.f32.gmra.mxu2 %v642_v20 }
 0x3c3   :  { %948 = vmatmul.f32.gmra.mxu3 %v642_v20 }
 0x3ca   :  { %886 = vmatmul.f32.gmra.mxu2 %v643_v23 }
 0x3cb   :  { %951 = vmatmul.f32.gmra.mxu3 %v643_v23  ;;  %v2006_v23 = vld [vmem:[#allocation30_spill] sm:$0xff] }
 0x3d2   :  { %889 = vmatmul.f32.gmra.mxu2 %v644_v13 }
 0x3d3   :  { %954 = vmatmul.f32.gmra.mxu3 %v644_v13  ;;  %v2007_v13 = vmax.f32 %v2006_v23, 0.0  ;;  %v670_v23 = vld [vmem:[#allocation10 + $0x190] sm:$0xff] }
 0x3da   :  { %892 = vmatmul.f32.gmra.mxu2 %v645_v44 }
 0x3db   :  { %957 = vmatmul.f32.gmra.mxu3 %v645_v44 }
 0x3e2   :  { %895 = vmatmul.f32.gmra.mxu2 %v646_v26 }
 0x3e3   :  { %960 = vmatmul.f32.gmra.mxu3 %v646_v26  ;;  %v2008_v26 = vld [vmem:[#allocation31_spill] sm:$0xff] }
 0x3ea   :  { %898 = vmatmul.f32.gmra.mxu2 %v647_v49 }
 0x3eb   :  { %963 = vmatmul.f32.gmra.mxu3 %v647_v49  ;;  %v2009_v49 = vmax.f32 %v2008_v26, 0.0 }
 0x3f2   :  { %901 = vmatmul.f32.gmra.mxu2 %v648_v9 }
 0x3f3   :  { %966 = vmatmul.f32.gmra.mxu3 %v648_v9 }
 0x3fa   :  { %904 = vmatmul.f32.gmra.mxu2 %v649_v27 }
 0x3fb   :  { %969 = vmatmul.f32.gmra.mxu3 %v649_v27 }
 0x402   :  { %907 = vmatmul.f32.gmra.mxu2 %v650_v16 }
 0x403   :  { %972 = vmatmul.f32.gmra.mxu3 %v650_v16  ;;  %v663_v16 = vld [vmem:[#allocation10 + $0x158] sm:$0xff] }
 0x40d   :  { %v863_v38 = vpop.f32.mrf.mxu2 }
 0x40e   :  { %v928_v39 = vpop.f32.mrf.mxu3  ;;  %v864_v58 = vadd.f32 %v863_v38, %v652_v54 }
 0x40f   :  { %v929_v12 = vadd.f32 %v928_v39, %v653_v55 }
 0x410   :  { %v976_v43 = vadd.f32 %v864_v58, %v1998_v42  ;;  %v2010_v58 = vld [vmem:[#allocation28_spill] sm:$0xff] }
 0x411   :  { %v977_v56 = vadd.f32 %v929_v12, %v1999_v40  ;;  %v2011_v12 = vmax.f32 %v2010_v58, 0.0  ;;  %v672_v58 = vld [vmem:[#allocation10 + $0x1a0] sm:$0xff] }
 0x412   :  { %v1008_v15 = vmax.f32 %v976_v43, 0.0  ;;  %v2012_v43 = vld [vmem:[#allocation29_spill] sm:$0xff] }
 0x413   :  { %v1009_v14 = vmax.f32 %v977_v56, 0.0  ;;  %v2013_v40 = vmax.f32 %v2012_v43, 0.0 }
 0x414   :  { %1040 = vst [vmem:[#allocation11] sm:$0xff] %v1008_v15 }
 0x415   :  { %1057 = vst [vmem:[#allocation11 + $0x80] sm:$0xff] %v1009_v14  ;;  %v866_v37 = vpop.f32.mrf.mxu2 }
 0x416   :  { %v931_v36 = vpop.f32.mrf.mxu3  ;;  %v867_v10 = vadd.f32 %v866_v37, %v654_v63  ;;  %v664_v63 = vld [vmem:[#allocation10 + $0x160] sm:$0xff] }
 0x417   :  { %v932_v17 = vadd.f32 %v931_v36, %v655_v62  ;;  %v665_v62 = vld [vmem:[#allocation10 + $0x168] sm:$0xff] }
 0x418   :  { %v978_v32 = vadd.f32 %v867_v10, %v2000_v33  ;;  %v2014_v33 = vld [vmem:[#allocation26_spill] sm:$0xff] }
 0x419   :  { %v979_v46 = vadd.f32 %v932_v17, %v2001_v0 }
 0x41a   :  { %v1010_v1 = vmax.f32 %v978_v32, 0.0  ;;  %v2015_v32 = vmax.f32 %v2014_v33, 0.0  ;;  %v674_v33 = vld [vmem:[#allocation10 + $0x1b0] sm:$0xff] }
 0x41b   :  { %v1011_v48 = vmax.f32 %v979_v46, 0.0  ;;  %v2016_v46 = vld [vmem:[#allocation27_spill] sm:$0xff] }
 0x41c   :  { %1041 = vst [vmem:[#allocation11 + $0x8] sm:$0xff] %v1010_v1  ;;  %v2017_v1 = vmax.f32 %v2016_v46, 0.0 }
 0x41d   :  { %1058 = vst [vmem:[#allocation11 + $0x88] sm:$0xff] %v1011_v48  ;;  %v869_v6 = vpop.f32.mrf.mxu2 }
 0x41e   :  { %v934_v7 = vpop.f32.mrf.mxu3  ;;  %v870_v5 = vadd.f32 %v869_v6, %v656_v3  ;;  %v666_v6 = vld [vmem:[#allocation10 + $0x170] sm:$0xff] }
 0x41f   :  { %v935_v4 = vadd.f32 %v934_v7, %v657_v2  ;;  %v667_v7 = vld [vmem:[#allocation10 + $0x178] sm:$0xff] }
 0x420   :  { %v980_v53 = vadd.f32 %v870_v5, %v2002_v18 }
 0x421   :  { %v981_v52 = vadd.f32 %v935_v4, %v2003_v11  ;;  %v2018_v11 = vld [vmem:[#allocation24_spill] sm:$0xff] }
 0x422   :  { %v1012_v8 = vmax.f32 %v980_v53, 0.0 }
 0x423   :  { %v1013_v24 = vmax.f32 %v981_v52, 0.0  ;;  %v2019_v52 = vmax.f32 %v2018_v11, 0.0  ;;  %v676_v11 = vld [vmem:[#allocation10 + $0x1c0] sm:$0xff] }
 0x424   :  { %1042 = vst [vmem:[#allocation11 + $0x10] sm:$0xff] %v1012_v8 }
 0x425   :  { %1059 = vst [vmem:[#allocation11 + $0x90] sm:$0xff] %v1013_v24  ;;  %v872_v22 = vpop.f32.mrf.mxu2  ;;  %v2020_v24 = vld [vmem:[#allocation25_spill] sm:$0xff] }
 0x426   :  { %v937_v25 = vpop.f32.mrf.mxu3  ;;  %v873_v21 = vadd.f32 %v872_v22, %v658_v30  ;;  %v2021_v30 = vmax.f32 %v2020_v24, 0.0 }
 0x427   :  { %v938_v35 = vadd.f32 %v937_v25, %v659_v45 }
 0x428   :  { %v982_v59 = vadd.f32 %v873_v21, %v2004_v50  ;;  %v668_v21 = vld [vmem:[#allocation10 + $0x180] sm:$0xff] }
 0x429   :  { %v983_v31 = vadd.f32 %v938_v35, %v2005_v19  ;;  %v669_v35 = vld [vmem:[#allocation10 + $0x188] sm:$0xff] }
 0x42a   :  { %v1014_v41 = vmax.f32 %v982_v59, 0.0 }
 0x42b   :  { %v1015_v57 = vmax.f32 %v983_v31, 0.0 }
 0x42c   :  { %1043 = vst [vmem:[#allocation11 + $0x18] sm:$0xff] %v1014_v41  ;;  %v2022_v41 = vld [vmem:[#allocation22_spill] sm:$0xff] }
 0x42d   :  { %1060 = vst [vmem:[#allocation11 + $0x98] sm:$0xff] %v1015_v57  ;;  %v875_v29 = vpop.f32.mrf.mxu2  ;;  %v2023_v57 = vmax.f32 %v2022_v41, 0.0  ;;  %v678_v41 = vld [vmem:[#allocation10 + $0x1d0] sm:$0xff] }
 0x42e   :  { %v940_v28 = vpop.f32.mrf.mxu3  ;;  %v876_v34 = vadd.f32 %v875_v29, %v660_v47 }
 0x42f   :  { %v941_v20 = vadd.f32 %v940_v28, %v661_v51  ;;  %v2024_v51 = vld [vmem:[#allocation23_spill] sm:$0xff] }
 0x430   :  { %v984_v44 = vadd.f32 %v876_v34, %v2007_v13  ;;  %v2025_v29 = vmax.f32 %v2024_v51, 0.0  ;;  %v671_v13 = vld [vmem:[#allocation10 + $0x198] sm:$0xff] }
 0x431   :  { %v985_v60 = vadd.f32 %v941_v20, %v2009_v49 }
 0x432   :  { %v1016_v9 = vmax.f32 %v984_v44, 0.0 }
 0x433   :  { %v1017_v27 = vmax.f32 %v985_v60, 0.0 }
 0x434   :  { %1044 = vst [vmem:[#allocation11 + $0x20] sm:$0xff] %v1016_v9  ;;  %v2026_v9 = vld [vmem:[#allocation20_spill] sm:$0xff] }
 0x435   :  { %1061 = vst [vmem:[#allocation11 + $0xa0] sm:$0xff] %v1017_v27  ;;  %v878_v54 = vpop.f32.mrf.mxu2  ;;  %v2027_v27 = vmax.f32 %v2026_v9, 0.0  ;;  %v680_v9 = vld [vmem:[#allocation10 + $0x1e0] sm:$0xff] }
 0x436   :  { %v943_v55 = vpop.f32.mrf.mxu3  ;;  %v879_v38 = vadd.f32 %v878_v54, %v662_v61 }
 0x437   :  { %v944_v39 = vadd.f32 %v943_v55, %v663_v16  ;;  %v2028_v16 = vld [vmem:[#allocation21_spill] sm:$0xff] }
 0x438   :  { %v986_v42 = vadd.f32 %v879_v38, %v2011_v12  ;;  %v2029_v54 = vmax.f32 %v2028_v16, 0.0  ;;  %v673_v12 = vld [vmem:[#allocation10 + $0x1a8] sm:$0xff] }
 0x439   :  { %v987_v56 = vadd.f32 %v944_v39, %v2013_v40 }
 0x43a   :  { %v1018_v15 = vmax.f32 %v986_v42, 0.0 }
 0x43b   :  { %v1019_v14 = vmax.f32 %v987_v56, 0.0 }
 0x43c   :  { %1045 = vst [vmem:[#allocation11 + $0x28] sm:$0xff] %v1018_v15  ;;  %v2030_v15 = vld [vmem:[#allocation18_spill] sm:$0xff] }
 0x43d   :  { %1062 = vst [vmem:[#allocation11 + $0xa8] sm:$0xff] %v1019_v14  ;;  %v881_v37 = vpop.f32.mrf.mxu2  ;;  %v2031_v14 = vmax.f32 %v2030_v15, 0.0  ;;  %v682_v15 = vld [vmem:[#allocation10 + $0x1f0] sm:$0xff] }
 0x43e   :  { %v946_v36 = vpop.f32.mrf.mxu3  ;;  %v882_v10 = vadd.f32 %v881_v37, %v664_v63 }
 0x43f   :  { %v947_v17 = vadd.f32 %v946_v36, %v665_v62  ;;  %v2032_v62 = vld [vmem:[#allocation19_spill] sm:$0xff] }
 0x440   :  { %v988_v0 = vadd.f32 %v882_v10, %v2015_v32  ;;  %v2033_v37 = vmax.f32 %v2032_v62, 0.0  ;;  %v675_v32 = vld [vmem:[#allocation10 + $0x1b8] sm:$0xff] }
 0x441   :  { %v989_v48 = vadd.f32 %v947_v17, %v2017_v1 }
 0x442   :  { %v1020_v3 = vmax.f32 %v988_v0, 0.0 }
 0x443   :  { %v1021_v2 = vmax.f32 %v989_v48, 0.0 }
 0x444   :  { %1046 = vst [vmem:[#allocation11 + $0x30] sm:$0xff] %v1020_v3  ;;  %v2034_v3 = vld [vmem:[#allocation16_spill] sm:$0xff] }
 0x445   :  { %1063 = vst [vmem:[#allocation11 + $0xb0] sm:$0xff] %v1021_v2  ;;  %v884_v5 = vpop.f32.mrf.mxu2  ;;  %v2035_v2 = vmax.f32 %v2034_v3, 0.0 }
 0x446   :  { %v949_v4 = vpop.f32.mrf.mxu3  ;;  %v885_v18 = vadd.f32 %v884_v5, %v666_v6 }
 0x447   :  { %v950_v53 = vadd.f32 %v949_v4, %v667_v7  ;;  %v2036_v7 = vld [vmem:[#allocation17_spill] sm:$0xff] }
 0x448   :  { %v990_v8 = vadd.f32 %v885_v18, %v2019_v52  ;;  %v2037_v5 = vmax.f32 %v2036_v7, 0.0  ;;  %v677_v52 = vld [vmem:[#allocation10 + $0x1c8] sm:$0xff] }
 0x449   :  { %v991_v45 = vadd.f32 %v950_v53, %v2021_v30 }
 0x44a   :  { %v1022_v22 = vmax.f32 %v990_v8, 0.0 }
 0x44b   :  { %v1023_v25 = vmax.f32 %v991_v45, 0.0 }
 0x44c   :  { %1047 = vst [vmem:[#allocation11 + $0x38] sm:$0xff] %v1022_v22  ;;  %v2038_v22 = vld [vmem:[#allocation46_spill] sm:$0xff] }
 0x44d   :  { %1064 = vst [vmem:[#allocation11 + $0xb8] sm:$0xff] %v1023_v25  ;;  %v887_v50 = vpop.f32.mrf.mxu2  ;;  %v2039_v25 = vmax.f32 %v2038_v22, 0.0 }
 0x44e   :  { %v952_v59 = vpop.f32.mrf.mxu3  ;;  %v888_v19 = vadd.f32 %v887_v50, %v668_v21 }
 0x44f   :  { %v953_v31 = vadd.f32 %v952_v59, %v669_v35  ;;  %v2040_v35 = vld [vmem:[#allocation47_spill] sm:$0xff] }
 0x450   :  { %v992_v47 = vadd.f32 %v888_v19, %v2023_v57  ;;  %v2041_v50 = vmax.f32 %v2040_v35, 0.0  ;;  %v679_v57 = vld [vmem:[#allocation10 + $0x1d8] sm:$0xff] }
 0x451   :  { %v993_v28 = vadd.f32 %v953_v31, %v2025_v29 }
 0x452   :  { %v1024_v34 = vmax.f32 %v992_v47, 0.0 }
 0x453   :  { %v1025_v20 = vmax.f32 %v993_v28, 0.0 }
 0x454   :  { %1048 = vst [vmem:[#allocation11 + $0x40] sm:$0xff] %v1024_v34  ;;  %v2042_v34 = vld [vmem:[#allocation44_spill] sm:$0xff] }
 0x455   :  { %1065 = vst [vmem:[#allocation11 + $0xc0] sm:$0xff] %v1025_v20  ;;  %v890_v44 = vpop.f32.mrf.mxu2  ;;  %v2043_v20 = vmax.f32 %v2042_v34, 0.0 }
 0x456   :  { %v955_v26 = vpop.f32.mrf.mxu3  ;;  %v891_v49 = vadd.f32 %v890_v44, %v670_v23 }
 0x457   :  { %v956_v60 = vadd.f32 %v955_v26, %v671_v13  ;;  %v2044_v13 = vld [vmem:[#allocation45_spill] sm:$0xff] }
 0x458   :  { %v994_v61 = vadd.f32 %v891_v49, %v2027_v27  ;;  %v2045_v44 = vmax.f32 %v2044_v13, 0.0  ;;  %v681_v27 = vld [vmem:[#allocation10 + $0x1e8] sm:$0xff] }
 0x459   :  { %v995_v55 = vadd.f32 %v956_v60, %v2029_v54 }
 0x45a   :  { %v1026_v38 = vmax.f32 %v994_v61, 0.0 }
 0x45b   :  { %v1027_v39 = vmax.f32 %v995_v55, 0.0 }
 0x45c   :  { %1049 = vst [vmem:[#allocation11 + $0x48] sm:$0xff] %v1026_v38  ;;  %v2046_v38 = vld [vmem:[#allocation42_spill] sm:$0xff] }
 0x45d   :  { %1066 = vst [vmem:[#allocation11 + $0xc8] sm:$0xff] %v1027_v39  ;;  %v893_v42 = vpop.f32.mrf.mxu2  ;;  %v2047_v39 = vmax.f32 %v2046_v38, 0.0 }
 0x45e   :  { %v958_v43 = vpop.f32.mrf.mxu3  ;;  %v894_v40 = vadd.f32 %v893_v42, %v672_v58 }
 0x45f   :  { %v959_v56 = vadd.f32 %v958_v43, %v673_v12  ;;  %v2048_v12 = vld [vmem:[#allocation43_spill] sm:$0xff] }
 0x460   :  { %v996_v63 = vadd.f32 %v894_v40, %v2031_v14  ;;  %v2049_v42 = vmax.f32 %v2048_v12, 0.0  ;;  %v683_v14 = vld [vmem:[#allocation10 + $0x1f8] sm:$0xff] }
 0x461   :  { %v997_v36 = vadd.f32 %v959_v56, %v2033_v37 }
 0x462   :  { %v1028_v10 = vmax.f32 %v996_v63, 0.0 }
 0x463   :  { %v1029_v17 = vmax.f32 %v997_v36, 0.0 }
 0x464   :  { %1050 = vst [vmem:[#allocation11 + $0x50] sm:$0xff] %v1028_v10  ;;  %v2050_v10 = vld [vmem:[#allocation40_spill] sm:$0xff] }
 0x465   :  { %1067 = vst [vmem:[#allocation11 + $0xd0] sm:$0xff] %v1029_v17  ;;  %v896_v0 = vpop.f32.mrf.mxu2  ;;  %v2051_v17 = vmax.f32 %v2050_v10, 0.0 }
 0x466   :  { %v961_v46 = vpop.f32.mrf.mxu3  ;;  %v897_v1 = vadd.f32 %v896_v0, %v674_v33 }
 0x467   :  { %v962_v48 = vadd.f32 %v961_v46, %v675_v32  ;;  %v2052_v32 = vld [vmem:[#allocation41_spill] sm:$0xff] }
 0x468   :  { %v998_v6 = vadd.f32 %v897_v1, %v2035_v2  ;;  %v2053_v0 = vmax.f32 %v2052_v32, 0.0 }
 0x469   :  { %v999_v4 = vadd.f32 %v962_v48, %v2037_v5 }
 0x46a   :  { %v1030_v18 = vmax.f32 %v998_v6, 0.0 }
 0x46b   :  { %v1031_v53 = vmax.f32 %v999_v4, 0.0 }
 0x46c   :  { %1051 = vst [vmem:[#allocation11 + $0x58] sm:$0xff] %v1030_v18 }
 0x46d   :  { %1068 = vst [vmem:[#allocation11 + $0xd8] sm:$0xff] %v1031_v53  ;;  %v899_v8 = vpop.f32.mrf.mxu2 }
 0x46e   :  { %v964_v24 = vpop.f32.mrf.mxu3  ;;  %v900_v30 = vadd.f32 %v899_v8, %v676_v11 }
 0x46f   :  { %v965_v45 = vadd.f32 %v964_v24, %v677_v52 }
 0x470   :  { %v1000_v21 = vadd.f32 %v900_v30, %v2039_v25 }
 0x471   :  { %v1001_v59 = vadd.f32 %v965_v45, %v2041_v50 }
 0x472   :  { %v1032_v19 = vmax.f32 %v1000_v21, 0.0 }
 0x473   :  { %v1033_v31 = vmax.f32 %v1001_v59, 0.0 }
 0x474   :  { %1052 = vst [vmem:[#allocation11 + $0x60] sm:$0xff] %v1032_v19 }
 0x475   :  { %1069 = vst [vmem:[#allocation11 + $0xe0] sm:$0xff] %v1033_v31  ;;  %v902_v47 = vpop.f32.mrf.mxu2 }
 0x476   :  { %v967_v51 = vpop.f32.mrf.mxu3  ;;  %v903_v29 = vadd.f32 %v902_v47, %v678_v41 }
 0x477   :  { %v968_v28 = vadd.f32 %v967_v51, %v679_v57 }
 0x478   :  { %v1002_v23 = vadd.f32 %v903_v29, %v2043_v20 }
 0x479   :  { %v1003_v26 = vadd.f32 %v968_v28, %v2045_v44 }
 0x47a   :  { %v1034_v49 = vmax.f32 %v1002_v23, 0.0 }
 0x47b   :  { %v1035_v60 = vmax.f32 %v1003_v26, 0.0 }
 0x47c   :  { %1053 = vst [vmem:[#allocation11 + $0x68] sm:$0xff] %v1034_v49 }
 0x47d   :  { %1070 = vst [vmem:[#allocation11 + $0xe8] sm:$0xff] %v1035_v60  ;;  %v905_v61 = vpop.f32.mrf.mxu2 }
 0x47e   :  { %v970_v16 = vpop.f32.mrf.mxu3  ;;  %v906_v54 = vadd.f32 %v905_v61, %v680_v9 }
 0x47f   :  { %v971_v55 = vadd.f32 %v970_v16, %v681_v27 }
 0x480   :  { %v1004_v58 = vadd.f32 %v906_v54, %v2047_v39 }
 0x481   :  { %v1005_v43 = vadd.f32 %v971_v55, %v2049_v42 }
 0x482   :  { %v1036_v40 = vmax.f32 %v1004_v58, 0.0 }
 0x483   :  { %v1037_v56 = vmax.f32 %v1005_v43, 0.0 }
 0x484   :  { %1054 = vst [vmem:[#allocation11 + $0x70] sm:$0xff] %v1036_v40 }
 0x485   :  { %1071 = vst [vmem:[#allocation11 + $0xf0] sm:$0xff] %v1037_v56  ;;  %v908_v63 = vpop.f32.mrf.mxu2 }
 0x486   :  { %v973_v62 = vpop.f32.mrf.mxu3  ;;  %v909_v37 = vadd.f32 %v908_v63, %v682_v15 }
 0x487   :  { %v974_v36 = vadd.f32 %v973_v62, %v683_v14 }
 0x488   :  { %v1006_v33 = vadd.f32 %v909_v37, %v2051_v17 }
 0x489   :  { %v1007_v46 = vadd.f32 %v974_v36, %v2053_v0 }
 0x48a   :  { %v1038_v1 = vmax.f32 %v1006_v33, 0.0 }
 0x48b   :  { %v1039_v48 = vmax.f32 %v1007_v46, 0.0 }
 0x48c   :  { %1055 = vst [vmem:[#allocation11 + $0x78] sm:$0xff] %v1038_v1 }
 0x48d   :  { %1072 = vst [vmem:[#allocation11 + $0xf8] sm:$0xff] %v1039_v48 }
 0x48e   :  { %1085 = dma.vmem_to_hbm [thread:$0]  %s1078_s18, 4096, %s1080_s21, [#allocation4], %s1257_s26, %s1257_s26, %s1258_s27  }
 0x48f   :  { %1254 = dma.done.wait [#allocation4], 4096  }
 0x490   :  { %1255 = vsyncadd [#allocation4], 4294963200 }
 0x491   :  { %1090 = vsyncpa [#allocation3], 1 }
 0x492   :  { %1091 = vsyncpa [#allocation6], 1 }
 0x493   :  { %1092 = vsyncpa [#allocation9], 1 }
 0x494   :  { %1093 = vsyncpa [#allocation4], 1 }

</bundles_post_ra>
